<compile_context>
chip_gen: v6e
topology: v6e:2x2x1
jax: 0.10.0
libtpu: 0.0.40
codegen_flags: <defaults>
</compile_context>

<pallas_src>
import jax
import jax.numpy as jnp
from jax.experimental import pallas as pl
from jax.experimental.pallas import tpu as pltpu


# ---------------------------------------------------------------------------
# Kernel
# ---------------------------------------------------------------------------

def overmlp_kernel(x_ref,
                   w1_ref, b1_ref,
                   w2_ref, b2_ref,
                   w3_ref, b3_ref,
                   w4_ref, b4_ref,
                   o_ref):
    """Fused 4-layer MLP: relu(fc1) -> relu(fc2) -> relu(fc3) -> fc4.

    x arrives f32 and is cast to bf16 on the VPU; weights are bf16; all matmuls
    accumulate in f32 on the MXU; biases are f32; the output is stored bf16.
    """
    x = x_ref[...].astype(jnp.bfloat16)            # (tb, D) bf16

    h = jnp.dot(x, w1_ref[...], preferred_element_type=jnp.float32) + b1_ref[...]
    h = jnp.maximum(h, 0.0).astype(jnp.bfloat16)

    h = jnp.dot(h, w2_ref[...], preferred_element_type=jnp.float32) + b2_ref[...]
    h = jnp.maximum(h, 0.0).astype(jnp.bfloat16)

    h = jnp.dot(h, w3_ref[...], preferred_element_type=jnp.float32) + b3_ref[...]
    h = jnp.maximum(h, 0.0).astype(jnp.bfloat16)

    out = jnp.dot(h, w4_ref[...], preferred_element_type=jnp.float32) + b4_ref[...]
    o_ref[...] = out.astype(o_ref.dtype)           # bf16 store (half the writeback)


# ---------------------------------------------------------------------------
# Parameter preparation (hoisted out of the per-call path)
# ---------------------------------------------------------------------------

def _round_up(x, m):
    return ((x + m - 1) // m) * m


def _pad2(a, rows, cols):
    r, c = a.shape
    return jnp.pad(a, ((0, rows - r), (0, cols - c)))


def prepare_overmlp_params(params):
    """Pad + bf16-cast the weights ONCE (not per forward call).

    params: ((w1,b1),(w2,b2),(w3,b3),(w4,b4)), w_i shaped (in, out), b_i (1, out), f32.
    Zero padding of rows/cols is mathematically exact for the valid outputs because
    relu(0 + 0) = 0 feeds zero rows of the next layer's weight.
    """
    (w1, b1), (w2, b2), (w3, b3), (w4, b4) = params
    D = w1.shape[0]
    nc = w4.shape[1]
    h1 = w1.shape[1]                     # 32 * over_factor
    h2 = w3.shape[1]                     # 64 * over_factor

    h1p = _round_up(h1, 128)
    h2p = _round_up(h2, 128)
    ncp = _round_up(nc, 128)

    weights = (
        _pad2(w1, D,   h1p).astype(jnp.bfloat16), _pad2(b1, 1, h1p).astype(jnp.float32),
        _pad2(w2, h1p, h1p).astype(jnp.bfloat16), _pad2(b2, 1, h1p).astype(jnp.float32),
        _pad2(w3, h1p, h2p).astype(jnp.bfloat16), _pad2(b3, 1, h2p).astype(jnp.float32),
        _pad2(w4, h2p, ncp).astype(jnp.bfloat16), _pad2(b4, 1, ncp).astype(jnp.float32),
    )
    return {"dims": (D, nc, ncp), "weights": weights}


# ---------------------------------------------------------------------------
# Forward wrapper
# ---------------------------------------------------------------------------

_MEGACORE_SPLIT_MIN = 512   # if a single tile would cover >= this many rows, split in 2


def _choose_tile(B, tb_max):
    """Pick the batch tile: large tiles to amortize step overhead, but >=2 grid
    steps for moderately large batches so v7x megacore can shard the axis."""
    B8 = _round_up(max(B, 1), 8)
    if B8 > tb_max:
        tb = tb_max                                       # already >= 2 grid steps
    elif B8 >= _MEGACORE_SPLIT_MIN:
        tb = min(tb_max, _round_up((B8 + 1) // 2, 256))   # split across 2 TensorCores
    else:
        tb = B8                                           # single step for tiny batches
    B_pad = _round_up(B8, tb)
    return tb, B_pad


def _call_kernel(x_p, weights, *, tb, B_pad, D, ncp, single_buffer):
    (w1p, b1p, w2p, b2p, w3p, b3p, w4p, b4p) = weights
    h1p = w1p.shape[1]
    h2p = w3p.shape[1]

    def const_spec(arr):
        nd = arr.ndim
        if single_buffer:
            # Grid-invariant: DMA'd once, never revisited -> 1 buffer is enough.
            return pl.BlockSpec(arr.shape, lambda i, _nd=nd: (0,) * _nd,
                                pipeline_mode=pl.Buffered(1))
        return pl.BlockSpec(arr.shape, lambda i, _nd=nd: (0,) * _nd)

    # Explicit VMEM budget (scales with tb): weights/biases (x1 or x2 buffers),
    # double-buffered f32 x tile + bf16 output tile, and the f32/bf16 activation
    # temporaries the compiler materializes per batch row.  Cap below per-gen limits.
    nbuf = 1 if single_buffer else 2
    weight_bytes = nbuf * int(sum(w.size * 2 for w in (w1p, w2p, w3p, w4p)))
    bias_bytes = nbuf * int(sum(b.size * 4 for b in (b1p, b2p, b3p, b4p)))
    io_bytes = 2 * tb * D * 4 + 2 * tb * ncp * 2
    interm_bytes = tb * (2 * D + 12 * h1p + 6 * h2p + 4 * ncp)
    vmem_limit = int(1.5 * (weight_bytes + bias_bytes + io_bytes + interm_bytes))
    vmem_limit = max(min(vmem_limit, 48 << 20), 16 << 20)   # fits v5e/v6e/v7x

    flops = int(2 * B_pad * (D * h1p + h1p * h1p + h1p * h2p + h2p * ncp))
    bytes_accessed = int(weight_bytes + bias_bytes
                         + 4 * B_pad * D        # f32 input
                         + 2 * B_pad * ncp)     # bf16 output

    return pl.pallas_call(
        overmlp_kernel,
        out_shape=jax.ShapeDtypeStruct((B_pad, ncp), jnp.bfloat16),
        grid_spec=pltpu.PrefetchScalarGridSpec(
            num_scalar_prefetch=0,
            grid=(B_pad // tb,),
            in_specs=[
                pl.BlockSpec((tb, D), lambda i: (i, 0)),   # x: tiled over batch
                const_spec(w1p), const_spec(b1p),          # grid-invariant weights
                const_spec(w2p), const_spec(b2p),
                const_spec(w3p), const_spec(b3p),
                const_spec(w4p), const_spec(b4p),
            ],
            out_specs=pl.BlockSpec((tb, ncp), lambda i: (i, 0)),   # lane-dense output
        ),
        compiler_params=pltpu.CompilerParams(
            dimension_semantics=("parallel",),
            vmem_limit_bytes=vmem_limit),
        cost_estimate=pl.CostEstimate(flops=flops,
                                      transcendentals=0,
                                      bytes_accessed=bytes_accessed),
    )(x_p, w1p, b1p, w2p, b2p, w3p, b3p, w4p, b4p)


def overmlp_forward(x, prepared, *, tb_max=2048):
    """Run the fused OverMLP kernel.

    x: (B, input_dim) float32.
    prepared: output of prepare_overmlp_params(params) (padding/casting done once).
    tb_max: maximum batch tile (multiple of 256 recommended; default 2048).
    """
    B, D = x.shape
    D_p, nc, ncp = prepared["dims"]
    assert D == D_p, "input dim mismatch with prepared params"

    tb, B_pad = _choose_tile(B, tb_max)
    x_p = x if B_pad == B else jnp.pad(x, ((0, B_pad - B), (0, 0)))
    # x stays f32: the bf16 cast happens inside the kernel (free VPU work) instead of
    # an extra wrapper-side HBM pass.

    try:
        out = _call_kernel(x_p, prepared["weights"], tb=tb, B_pad=B_pad, D=D,
                           ncp=ncp, single_buffer=True)
    except Exception:
        # Fallback if pl.Buffered(1) is rejected by this jax/Mosaic build: default
        # double-buffering of the (small) grid-invariant weights.
        out = _call_kernel(x_p, prepared["weights"], tb=tb, B_pad=B_pad, D=D,
                           ncp=ncp, single_buffer=False)

    return out[:B, :nc].astype(jnp.float32)


# ---------------------------------------------------------------------------
# Params / references
# ---------------------------------------------------------------------------

def init_linear(key, in_features, out_features):
    """Deterministic init mimicking torch.nn.Linear defaults (U(-k, k), k=1/sqrt(in)).
    Stored as (in, out) so the kernel can do x @ W + b."""
    kw, kb = jax.random.split(key)
    k = 1.0 / jnp.sqrt(jnp.float32(in_features))
    w = jax.random.uniform(kw, (in_features, out_features), jnp.float32, -k, k)
    b = jax.random.uniform(kb, (1, out_features), jnp.float32, -k, k)
    return w, b


def init_overmlp_params(key, input_dim=32, num_classes=10, over_factor=5):
    k1, k2, k3, k4 = jax.random.split(key, 4)
    h1 = 32 * over_factor   # fc1 / fc2 width
    h2 = 64 * over_factor   # fc3 out / fc4 in width
    p1 = init_linear(k1, input_dim, h1)    # fc1: input_dim -> 32*of
    p2 = init_linear(k2, h1, h1)           # fc2: 32*of -> 32*of
    p3 = init_linear(k3, h1, h2)           # fc3: (adjusted in) 32*of -> 64*of
    p4 = init_linear(k4, h2, num_classes)  # fc4: 64*of -> num_classes
    return (p1, p2, p3, p4)


def overmlp_reference_f32(x, params):
    (w1, b1), (w2, b2), (w3, b3), (w4, b4) = params
    h = jnp.maximum(x @ w1 + b1, 0.0)
    h = jnp.maximum(h @ w2 + b2, 0.0)
    h = jnp.maximum(h @ w3 + b3, 0.0)
    return h @ w4 + b4


def overmlp_reference_bf16(x, params):
    """Reference mimicking kernel numerics: bf16 operands, f32 accumulate, bf16 output."""
    def q(a):
        return a.astype(jnp.bfloat16).astype(jnp.float32)
    (w1, b1), (w2, b2), (w3, b3), (w4, b4) = params
    h = q(jnp.maximum(q(x) @ q(w1) + b1, 0.0))
    h = q(jnp.maximum(h @ q(w2) + b2, 0.0))
    h = q(jnp.maximum(h @ q(w3) + b3, 0.0))
    return q(h @ q(w4) + b4)


# ---------------------------------------------------------------------------
# Test
# ---------------------------------------------------------------------------

if __name__ == "__main__":
    key = jax.random.PRNGKey(0)
    kx, kx2, kp = jax.random.split(key, 3)

    batch, input_dim, num_classes, over_factor = 8, 32, 10, 5
    params = init_overmlp_params(kp, input_dim=input_dim,
                                 num_classes=num_classes,
                                 over_factor=over_factor)
    prepared = prepare_overmlp_params(params)   # pad + bf16-cast once

    # --- small batch: single grid step ---
    x = jax.random.normal(kx, (batch, input_dim), jnp.float32)
    out = jax.block_until_ready(overmlp_forward(x, prepared))
    assert out.shape == (batch, num_classes)

    ref_bf16 = overmlp_reference_bf16(x, params)
    assert jnp.allclose(out, ref_bf16, atol=1e-2, rtol=1e-2), \
        "kernel mismatch vs bf16 reference (small batch)"
    ref_f32 = overmlp_reference_f32(x, params)
    assert jnp.allclose(out, ref_f32, atol=5e-2, rtol=5e-2), \
        "kernel mismatch vs f32 reference (small batch)"

    # --- moderate batch: exercises the >=2-step megacore split + batch padding path ---
    batch2 = 600
    x2 = jax.random.normal(kx2, (batch2, input_dim), jnp.float32)
    out2 = jax.block_until_ready(overmlp_forward(x2, prepared))
    assert out2.shape == (batch2, num_classes)
    ref2 = overmlp_reference_bf16(x2, params)
    assert jnp.allclose(out2, ref2, atol=1e-2, rtol=1e-2), \
        "kernel mismatch vs bf16 reference (tiled batch)"

    print("KERNEL_OK")
</pallas_src>

<mosaic_0001>
module attributes {stable_mosaic.version = 11 : i64} {
  func.func @overmlp_kernel(%arg0: i32, %arg1: memref<8x32xf32, #tpu.memory_space<vmem>>, %arg2: memref<32x256xbf16, #tpu.memory_space<vmem>>, %arg3: memref<1x256xf32, #tpu.memory_space<vmem>>, %arg4: memref<256x256xbf16, #tpu.memory_space<vmem>>, %arg5: memref<1x256xf32, #tpu.memory_space<vmem>>, %arg6: memref<256x384xbf16, #tpu.memory_space<vmem>>, %arg7: memref<1x384xf32, #tpu.memory_space<vmem>>, %arg8: memref<384x128xbf16, #tpu.memory_space<vmem>>, %arg9: memref<1x128xf32, #tpu.memory_space<vmem>>, %arg10: memref<8x128xbf16, #tpu.memory_space<vmem>>) attributes {dimension_semantics = [#tpu.dimension_semantics<parallel>], iteration_bounds = array<i64: 1>, scalar_prefetch = 0 : i64, scratch_operands = 0 : i64, tpu.core_type = #tpu.core_type<tc>, window_params = [{transform_indices = @transform_0, window_bounds = array<i64: 8, 32>}, {pipeline_mode = #tpu.pipeline_mode<synchronous>, transform_indices = @transform_1, window_bounds = array<i64: 32, 256>}, {pipeline_mode = #tpu.pipeline_mode<synchronous>, transform_indices = @transform_2, window_bounds = array<i64: 1, 256>}, {pipeline_mode = #tpu.pipeline_mode<synchronous>, transform_indices = @transform_3, window_bounds = array<i64: 256, 256>}, {pipeline_mode = #tpu.pipeline_mode<synchronous>, transform_indices = @transform_4, window_bounds = array<i64: 1, 256>}, {pipeline_mode = #tpu.pipeline_mode<synchronous>, transform_indices = @transform_5, window_bounds = array<i64: 256, 384>}, {pipeline_mode = #tpu.pipeline_mode<synchronous>, transform_indices = @transform_6, window_bounds = array<i64: 1, 384>}, {pipeline_mode = #tpu.pipeline_mode<synchronous>, transform_indices = @transform_7, window_bounds = array<i64: 384, 128>}, {pipeline_mode = #tpu.pipeline_mode<synchronous>, transform_indices = @transform_8, window_bounds = array<i64: 1, 128>}, {transform_indices = @transform_9, window_bounds = array<i64: 8, 128>}]} {
    %c0 = arith.constant 0 : index
    %c0_0 = arith.constant 0 : index
    %0 = vector.load %arg1[%c0, %c0_0] : memref<8x32xf32, #tpu.memory_space<vmem>>, vector<8x32xf32>
    %1 = arith.truncf %0 : vector<8x32xf32> to vector<8x32xbf16>
    %c0_1 = arith.constant 0 : index
    %c0_2 = arith.constant 0 : index
    %2 = vector.load %arg2[%c0_1, %c0_2] : memref<32x256xbf16, #tpu.memory_space<vmem>>, vector<32x256xbf16>
    %cst = arith.constant dense<0.000000e+00> : vector<8x256xf32>
    %3 = tpu.matmul %1, %2, %cst {dimension_numbers = #tpu.dot_dimension_numbers<[1], [0], [0], [1], [0, 0, 1, 1], [], []>} : vector<8x32xbf16>, vector<32x256xbf16>, vector<8x256xf32> -> vector<8x256xf32>
    %c0_3 = arith.constant 0 : index
    %c0_4 = arith.constant 0 : index
    %4 = vector.load %arg3[%c0_3, %c0_4] : memref<1x256xf32, #tpu.memory_space<vmem>>, vector<1x256xf32>
    %5 = vector.broadcast %4 : vector<1x256xf32> to vector<8x256xf32>
    %6 = arith.addf %3, %5 : vector<8x256xf32>
    %cst_5 = arith.constant 0.000000e+00 : f32
    %7 = vector.broadcast %cst_5 : f32 to vector<8x256xf32>
    %8 = arith.maximumf %6, %7 : vector<8x256xf32>
    %9 = arith.truncf %8 : vector<8x256xf32> to vector<8x256xbf16>
    %c0_6 = arith.constant 0 : index
    %c0_7 = arith.constant 0 : index
    %10 = vector.load %arg4[%c0_6, %c0_7] : memref<256x256xbf16, #tpu.memory_space<vmem>>, vector<256x256xbf16>
    %cst_8 = arith.constant dense<0.000000e+00> : vector<8x256xf32>
    %11 = tpu.matmul %9, %10, %cst_8 {dimension_numbers = #tpu.dot_dimension_numbers<[1], [0], [0], [1], [0, 0, 1, 1], [], []>} : vector<8x256xbf16>, vector<256x256xbf16>, vector<8x256xf32> -> vector<8x256xf32>
    %c0_9 = arith.constant 0 : index
    %c0_10 = arith.constant 0 : index
    %12 = vector.load %arg5[%c0_9, %c0_10] : memref<1x256xf32, #tpu.memory_space<vmem>>, vector<1x256xf32>
    %13 = vector.broadcast %12 : vector<1x256xf32> to vector<8x256xf32>
    %14 = arith.addf %11, %13 : vector<8x256xf32>
    %cst_11 = arith.constant 0.000000e+00 : f32
    %15 = vector.broadcast %cst_11 : f32 to vector<8x256xf32>
    %16 = arith.maximumf %14, %15 : vector<8x256xf32>
    %17 = arith.truncf %16 : vector<8x256xf32> to vector<8x256xbf16>
    %c0_12 = arith.constant 0 : index
    %c0_13 = arith.constant 0 : index
    %18 = vector.load %arg6[%c0_12, %c0_13] : memref<256x384xbf16, #tpu.memory_space<vmem>>, vector<256x384xbf16>
    %cst_14 = arith.constant dense<0.000000e+00> : vector<8x384xf32>
    %19 = tpu.matmul %17, %18, %cst_14 {dimension_numbers = #tpu.dot_dimension_numbers<[1], [0], [0], [1], [0, 0, 1, 1], [], []>} : vector<8x256xbf16>, vector<256x384xbf16>, vector<8x384xf32> -> vector<8x384xf32>
    %c0_15 = arith.constant 0 : index
    %c0_16 = arith.constant 0 : index
    %20 = vector.load %arg7[%c0_15, %c0_16] : memref<1x384xf32, #tpu.memory_space<vmem>>, vector<1x384xf32>
    %21 = vector.broadcast %20 : vector<1x384xf32> to vector<8x384xf32>
    %22 = arith.addf %19, %21 : vector<8x384xf32>
    %cst_17 = arith.constant 0.000000e+00 : f32
    %23 = vector.broadcast %cst_17 : f32 to vector<8x384xf32>
    %24 = arith.maximumf %22, %23 : vector<8x384xf32>
    %25 = arith.truncf %24 : vector<8x384xf32> to vector<8x384xbf16>
    %c0_18 = arith.constant 0 : index
    %c0_19 = arith.constant 0 : index
    %26 = vector.load %arg8[%c0_18, %c0_19] : memref<384x128xbf16, #tpu.memory_space<vmem>>, vector<384x128xbf16>
    %cst_20 = arith.constant dense<0.000000e+00> : vector<8x128xf32>
    %27 = tpu.matmul %25, %26, %cst_20 {dimension_numbers = #tpu.dot_dimension_numbers<[1], [0], [0], [1], [0, 0, 1, 1], [], []>} : vector<8x384xbf16>, vector<384x128xbf16>, vector<8x128xf32> -> vector<8x128xf32>
    %c0_21 = arith.constant 0 : index
    %c0_22 = arith.constant 0 : index
    %28 = vector.load %arg9[%c0_21, %c0_22] : memref<1x128xf32, #tpu.memory_space<vmem>>, vector<1x128xf32>
    %29 = vector.broadcast %28 : vector<1x128xf32> to vector<8x128xf32>
    %30 = arith.addf %27, %29 : vector<8x128xf32>
    %31 = arith.truncf %30 : vector<8x128xf32> to vector<8x128xbf16>
    %c0_23 = arith.constant 0 : index
    %c0_24 = arith.constant 0 : index
    %32 = vector.load %arg10[%c0_23, %c0_24] : memref<8x128xbf16, #tpu.memory_space<vmem>>, vector<8x128xbf16>
    tpu.vector_store %arg10[%c0_23, %c0_24], %31 {strides = array<i32>} : memref<8x128xbf16, #tpu.memory_space<vmem>>, vector<8x128xbf16>,
    return
  }
  func.func @transform_0(%arg0: i32) -> (i32, i32) {
    %c0_i32 = arith.constant 0 : i32
    %c0_i32_0 = arith.constant 0 : i32
    return %arg0, %c0_i32 : i32, i32
  }
  func.func @transform_1(%arg0: i32) -> (i32, i32) {
    %c0_i32 = arith.constant 0 : i32
    %c0_i32_0 = arith.constant 0 : i32
    %c0_i32_1 = arith.constant 0 : i32
    return %c0_i32, %c0_i32_0 : i32, i32
  }
  func.func @transform_2(%arg0: i32) -> (i32, i32) {
    %c0_i32 = arith.constant 0 : i32
    %c0_i32_0 = arith.constant 0 : i32
    %c0_i32_1 = arith.constant 0 : i32
    return %c0_i32, %c0_i32_0 : i32, i32
  }
  func.func @transform_3(%arg0: i32) -> (i32, i32) {
    %c0_i32 = arith.constant 0 : i32
    %c0_i32_0 = arith.constant 0 : i32
    %c0_i32_1 = arith.constant 0 : i32
    return %c0_i32, %c0_i32_0 : i32, i32
  }
  func.func @transform_4(%arg0: i32) -> (i32, i32) {
    %c0_i32 = arith.constant 0 : i32
    %c0_i32_0 = arith.constant 0 : i32
    %c0_i32_1 = arith.constant 0 : i32
    return %c0_i32, %c0_i32_0 : i32, i32
  }
  func.func @transform_5(%arg0: i32) -> (i32, i32) {
    %c0_i32 = arith.constant 0 : i32
    %c0_i32_0 = arith.constant 0 : i32
    %c0_i32_1 = arith.constant 0 : i32
    return %c0_i32, %c0_i32_0 : i32, i32
  }
  func.func @transform_6(%arg0: i32) -> (i32, i32) {
    %c0_i32 = arith.constant 0 : i32
    %c0_i32_0 = arith.constant 0 : i32
    %c0_i32_1 = arith.constant 0 : i32
    return %c0_i32, %c0_i32_0 : i32, i32
  }
  func.func @transform_7(%arg0: i32) -> (i32, i32) {
    %c0_i32 = arith.constant 0 : i32
    %c0_i32_0 = arith.constant 0 : i32
    %c0_i32_1 = arith.constant 0 : i32
    return %c0_i32, %c0_i32_0 : i32, i32
  }
  func.func @transform_8(%arg0: i32) -> (i32, i32) {
    %c0_i32 = arith.constant 0 : i32
    %c0_i32_0 = arith.constant 0 : i32
    %c0_i32_1 = arith.constant 0 : i32
    return %c0_i32, %c0_i32_0 : i32, i32
  }
  func.func @transform_9(%arg0: i32) -> (i32, i32) {
    %c0_i32 = arith.constant 0 : i32
    %c0_i32_0 = arith.constant 0 : i32
    return %arg0, %c0_i32 : i32, i32
  }
}

module attributes {stable_mosaic.version = 11 : i64} {
  func.func @overmlp_kernel(%arg0: i32, %arg1: memref<8x32xf32, #tpu.memory_space<vmem>>, %arg2: memref<32x256xbf16, #tpu.memory_space<vmem>>, %arg3: memref<1x256xf32, #tpu.memory_space<vmem>>, %arg4: memref<256x256xbf16, #tpu.memory_space<vmem>>, %arg5: memref<1x256xf32, #tpu.memory_space<vmem>>, %arg6: memref<256x384xbf16, #tpu.memory_space<vmem>>, %arg7: memref<1x384xf32, #tpu.memory_space<vmem>>, %arg8: memref<384x128xbf16, #tpu.memory_space<vmem>>, %arg9: memref<1x128xf32, #tpu.memory_space<vmem>>, %arg10: memref<8x128xbf16, #tpu.memory_space<vmem>>) attributes {dimension_semantics = [#tpu.dimension_semantics<parallel>], iteration_bounds = array<i64: 1>, scalar_prefetch = 0 : i64, scratch_operands = 0 : i64, tpu.core_type = #tpu.core_type<tc>, window_params = [{transform_indices = @transform_0, window_bounds = array<i64: 8, 32>}, {pipeline_mode = #tpu.pipeline_mode<synchronous>, transform_indices = @transform_1, window_bounds = array<i64: 32, 256>}, {pipeline_mode = #tpu.pipeline_mode<synchronous>, transform_indices = @transform_2, window_bounds = array<i64: 1, 256>}, {pipeline_mode = #tpu.pipeline_mode<synchronous>, transform_indices = @transform_3, window_bounds = array<i64: 256, 256>}, {pipeline_mode = #tpu.pipeline_mode<synchronous>, transform_indices = @transform_4, window_bounds = array<i64: 1, 256>}, {pipeline_mode = #tpu.pipeline_mode<synchronous>, transform_indices = @transform_5, window_bounds = array<i64: 256, 384>}, {pipeline_mode = #tpu.pipeline_mode<synchronous>, transform_indices = @transform_6, window_bounds = array<i64: 1, 384>}, {pipeline_mode = #tpu.pipeline_mode<synchronous>, transform_indices = @transform_7, window_bounds = array<i64: 384, 128>}, {pipeline_mode = #tpu.pipeline_mode<synchronous>, transform_indices = @transform_8, window_bounds = array<i64: 1, 128>}, {transform_indices = @transform_9, window_bounds = array<i64: 8, 128>}]} {
    %c0 = arith.constant 0 : index
    %c0_0 = arith.constant 0 : index
    %0 = vector.load %arg1[%c0, %c0_0] : memref<8x32xf32, #tpu.memory_space<vmem>>, vector<8x32xf32>
    %1 = arith.truncf %0 : vector<8x32xf32> to vector<8x32xbf16>
    %c0_1 = arith.constant 0 : index
    %c0_2 = arith.constant 0 : index
    %2 = vector.load %arg2[%c0_1, %c0_2] : memref<32x256xbf16, #tpu.memory_space<vmem>>, vector<32x256xbf16>
    %cst = arith.constant dense<0.000000e+00> : vector<8x256xf32>
    %3 = tpu.matmul %1, %2, %cst {dimension_numbers = #tpu.dot_dimension_numbers<[1], [0], [0], [1], [0, 0, 1, 1], [], []>} : vector<8x32xbf16>, vector<32x256xbf16>, vector<8x256xf32> -> vector<8x256xf32>
    %c0_3 = arith.constant 0 : index
    %c0_4 = arith.constant 0 : index
    %4 = vector.load %arg3[%c0_3, %c0_4] : memref<1x256xf32, #tpu.memory_space<vmem>>, vector<1x256xf32>
    %5 = vector.broadcast %4 : vector<1x256xf32> to vector<8x256xf32>
    %6 = arith.addf %3, %5 : vector<8x256xf32>
    %cst_5 = arith.constant 0.000000e+00 : f32
    %7 = vector.broadcast %cst_5 : f32 to vector<8x256xf32>
    %8 = arith.maximumf %6, %7 : vector<8x256xf32>
    %9 = arith.truncf %8 : vector<8x256xf32> to vector<8x256xbf16>
    %c0_6 = arith.constant 0 : index
    %c0_7 = arith.constant 0 : index
    %10 = vector.load %arg4[%c0_6, %c0_7] : memref<256x256xbf16, #tpu.memory_space<vmem>>, vector<256x256xbf16>
    %cst_8 = arith.constant dense<0.000000e+00> : vector<8x256xf32>
    %11 = tpu.matmul %9, %10, %cst_8 {dimension_numbers = #tpu.dot_dimension_numbers<[1], [0], [0], [1], [0, 0, 1, 1], [], []>} : vector<8x256xbf16>, vector<256x256xbf16>, vector<8x256xf32> -> vector<8x256xf32>
    %c0_9 = arith.constant 0 : index
    %c0_10 = arith.constant 0 : index
    %12 = vector.load %arg5[%c0_9, %c0_10] : memref<1x256xf32, #tpu.memory_space<vmem>>, vector<1x256xf32>
    %13 = vector.broadcast %12 : vector<1x256xf32> to vector<8x256xf32>
    %14 = arith.addf %11, %13 : vector<8x256xf32>
    %cst_11 = arith.constant 0.000000e+00 : f32
    %15 = vector.broadcast %cst_11 : f32 to vector<8x256xf32>
    %16 = arith.maximumf %14, %15 : vector<8x256xf32>
    %17 = arith.truncf %16 : vector<8x256xf32> to vector<8x256xbf16>
    %c0_12 = arith.constant 0 : index
    %c0_13 = arith.constant 0 : index
    %18 = vector.load %arg6[%c0_12, %c0_13] : memref<256x384xbf16, #tpu.memory_space<vmem>>, vector<256x384xbf16>
    %cst_14 = arith.constant dense<0.000000e+00> : vector<8x384xf32>
    %19 = tpu.matmul %17, %18, %cst_14 {dimension_numbers = #tpu.dot_dimension_numbers<[1], [0], [0], [1], [0, 0, 1, 1], [], []>} : vector<8x256xbf16>, vector<256x384xbf16>, vector<8x384xf32> -> vector<8x384xf32>
    %c0_15 = arith.constant 0 : index
    %c0_16 = arith.constant 0 : index
    %20 = vector.load %arg7[%c0_15, %c0_16] : memref<1x384xf32, #tpu.memory_space<vmem>>, vector<1x384xf32>
    %21 = vector.broadcast %20 : vector<1x384xf32> to vector<8x384xf32>
    %22 = arith.addf %19, %21 : vector<8x384xf32>
    %cst_17 = arith.constant 0.000000e+00 : f32
    %23 = vector.broadcast %cst_17 : f32 to vector<8x384xf32>
    %24 = arith.maximumf %22, %23 : vector<8x384xf32>
    %25 = arith.truncf %24 : vector<8x384xf32> to vector<8x384xbf16>
    %c0_18 = arith.constant 0 : index
    %c0_19 = arith.constant 0 : index
    %26 = vector.load %arg8[%c0_18, %c0_19] : memref<384x128xbf16, #tpu.memory_space<vmem>>, vector<384x128xbf16>
    %cst_20 = arith.constant dense<0.000000e+00> : vector<8x128xf32>
    %27 = tpu.matmul %25, %26, %cst_20 {dimension_numbers = #tpu.dot_dimension_numbers<[1], [0], [0], [1], [0, 0, 1, 1], [], []>} : vector<8x384xbf16>, vector<384x128xbf16>, vector<8x128xf32> -> vector<8x128xf32>
    %c0_21 = arith.constant 0 : index
    %c0_22 = arith.constant 0 : index
    %28 = vector.load %arg9[%c0_21, %c0_22] : memref<1x128xf32, #tpu.memory_space<vmem>>, vector<1x128xf32>
    %29 = vector.broadcast %28 : vector<1x128xf32> to vector<8x128xf32>
    %30 = arith.addf %27, %29 : vector<8x128xf32>
    %31 = arith.truncf %30 : vector<8x128xf32> to vector<8x128xbf16>
    %c0_23 = arith.constant 0 : index
    %c0_24 = arith.constant 0 : index
    %32 = vector.load %arg10[%c0_23, %c0_24] : memref<8x128xbf16, #tpu.memory_space<vmem>>, vector<8x128xbf16>
    tpu.vector_store %arg10[%c0_23, %c0_24], %31 {strides = array<i32>} : memref<8x128xbf16, #tpu.memory_space<vmem>>, vector<8x128xbf16>,
    return
  }
  func.func @transform_0(%arg0: i32) -> (i32, i32) {
    %c0_i32 = arith.constant 0 : i32
    %c0_i32_0 = arith.constant 0 : i32
    return %arg0, %c0_i32 : i32, i32
  }
  func.func @transform_1(%arg0: i32) -> (i32, i32) {
    %c0_i32 = arith.constant 0 : i32
    %c0_i32_0 = arith.constant 0 : i32
    %c0_i32_1 = arith.constant 0 : i32
    return %c0_i32, %c0_i32_0 : i32, i32
  }
  func.func @transform_2(%arg0: i32) -> (i32, i32) {
    %c0_i32 = arith.constant 0 : i32
    %c0_i32_0 = arith.constant 0 : i32
    %c0_i32_1 = arith.constant 0 : i32
    return %c0_i32, %c0_i32_0 : i32, i32
  }
  func.func @transform_3(%arg0: i32) -> (i32, i32) {
    %c0_i32 = arith.constant 0 : i32
    %c0_i32_0 = arith.constant 0 : i32
    %c0_i32_1 = arith.constant 0 : i32
    return %c0_i32, %c0_i32_0 : i32, i32
  }
  func.func @transform_4(%arg0: i32) -> (i32, i32) {
    %c0_i32 = arith.constant 0 : i32
    %c0_i32_0 = arith.constant 0 : i32
    %c0_i32_1 = arith.constant 0 : i32
    return %c0_i32, %c0_i32_0 : i32, i32
  }
  func.func @transform_5(%arg0: i32) -> (i32, i32) {
    %c0_i32 = arith.constant 0 : i32
    %c0_i32_0 = arith.constant 0 : i32
    %c0_i32_1 = arith.constant 0 : i32
    return %c0_i32, %c0_i32_0 : i32, i32
  }
  func.func @transform_6(%arg0: i32) -> (i32, i32) {
    %c0_i32 = arith.constant 0 : i32
    %c0_i32_0 = arith.constant 0 : i32
    %c0_i32_1 = arith.constant 0 : i32
    return %c0_i32, %c0_i32_0 : i32, i32
  }
  func.func @transform_7(%arg0: i32) -> (i32, i32) {
    %c0_i32 = arith.constant 0 : i32
    %c0_i32_0 = arith.constant 0 : i32
    %c0_i32_1 = arith.constant 0 : i32
    return %c0_i32, %c0_i32_0 : i32, i32
  }
  func.func @transform_8(%arg0: i32) -> (i32, i32) {
    %c0_i32 = arith.constant 0 : i32
    %c0_i32_0 = arith.constant 0 : i32
    %c0_i32_1 = arith.constant 0 : i32
    return %c0_i32, %c0_i32_0 : i32, i32
  }
  func.func @transform_9(%arg0: i32) -> (i32, i32) {
    %c0_i32 = arith.constant 0 : i32
    %c0_i32_0 = arith.constant 0 : i32
    return %arg0, %c0_i32 : i32, i32
  }
}

</mosaic_0001>

<bundles_post_ra>
// kernel: tpu_custom_call.1
= control target key start
LH: loop header
LB: loop body
LE: loop exit
PB: predicated region body
PF: predicated region fallthrough
CT: control target
= control target key end

     0   :  { %14 = vsyncpa [#allocation3], 0  ;;  %s1751_s0 = inlined_call_operand.hbm [shape: f32[8,32], index: 0, kind: input, shape index: {}]   ;;  %s1752_s1 = inlined_call_operand.hbm [shape: bf16[32,256], index: 1, kind: input, shape index: {}]   ;;  %s1753_s2 = inlined_call_operand.vmem [shape: f32[1,256], index: 2, kind: input, shape index: {}]   ;;  %s1754_s3 = inlined_call_operand.hbm [shape: bf16[256,256], index: 3, kind: input, shape index: {}]   ;;  %s1755_s4 = inlined_call_operand.vmem [shape: f32[1,256], index: 4, kind: input, shape index: {}]   ;;  %s1756_s5 = inlined_call_operand.hbm [shape: bf16[256,384], index: 5, kind: input, shape index: {}]   ;;  %s1757_s6 = inlined_call_operand.vmem [shape: f32[1,384], index: 6, kind: input, shape index: {}]   ;;  %s1758_s7 = inlined_call_operand.hbm [shape: bf16[384,128], index: 7, kind: input, shape index: {}]   ;;  %s1759_s8 = inlined_call_operand.vmem [shape: f32[1,128], index: 8, kind: input, shape index: {}]   ;;  %s1760_s9 = inlined_call_operand.hbm [shape: bf16[8,128], index: 9, kind: output, shape index: {}]  }
   0x1   :  { %15 = vsyncpa [#allocation6], 0 }
   0x2   :  { %16 = vsyncpa [#allocation9], 0 }
   0x3   :  { %17 = vsyncpa [#allocation4], 0  ;;  %s1626_s30 = smov [#allocation5]  }
   0x4   :  { %s33_s10 = sshll.u32 %s1626_s30, 4  ;;  %s34_s10 = int_to_ptr.vmem [resolvable:$true] %s33_s10 }
   0x5   :  { %s1506_s11 = scalar_lea.vmem %s34_s10, 512  ;;  %p1511_p1 = scmp.lt.s32.totalorder %s34_s10, %s34_s10 }
   0x6   :  { %p1507_p0 = scmp.ne.s32.totalorder %s34_s10, %s1506_s11  ;;  %p1512_p2 = scmp.lt.s32.totalorder %s1506_s11, %s1506_s11 }
   0x8   :  { %p1513_p3 = por %p1512_p2, %p1511_p1 }
   0xa   :  { %p1514_p4 = pnand %p1513_p3, %p1507_p0 }
   0xc   :  { %1517 = shalt.err (!%p1514_p4)
}
   0xd   :  { %s1627_s12 = smov 128   ;;  %s1628_s13 = smov 8  }
   0xe   :  { %39 = dma.hbm_to_vmem [thread:$0]  %s1752_s1, 512, %s34_s10, [#allocation6], %s1627_s12, %s1627_s12, %s1628_s13  }
   0xf   :  { %s1629_s16 = smov [#allocation8]  }
  0x10   :  { %s61_s17 = sshll.u32 %s1629_s16, 4  ;;  %s62_s17 = int_to_ptr.vmem [resolvable:$true] %s61_s17 }
  0x11   :  { %s1526_s18 = scalar_lea.vmem %s62_s17, 6144  ;;  %p1531_p6 = scmp.lt.s32.totalorder %s62_s17, %s62_s17 }
  0x12   :  { %p1527_p5 = scmp.ne.s32.totalorder %s62_s17, %s1526_s18  ;;  %p1532_p7 = scmp.lt.s32.totalorder %s1526_s18, %s1526_s18 }
  0x14   :  { %p1533_p8 = por %p1532_p7, %p1531_p6 }
  0x16   :  { %p1534_p9 = pnand %p1533_p8, %p1527_p5 }
  0x18   :  { %1537 = shalt.err (!%p1534_p9)
}
  0x19   :  { %s1630_s19 = smov 192   ;;  %s1631_s20 = smov 12  }
  0x1a   :  { %67 = dma.hbm_to_vmem [thread:$0]  %s1756_s5, 6144, %s62_s17, [#allocation9], %s1630_s19, %s1630_s19, %s1631_s20  }
  0x1b   :  { %s1632_s23 = smov [#allocation2]   ;;  %s1633_s25 = smov [#allocation7]  }
  0x1c   :  { %s24_s24 = sshll.u32 %s1632_s23, 4  ;;  %s47_s1 = sshll.u32 %s1633_s25, 4  ;;  %s25_s24 = int_to_ptr.vmem [resolvable:$true] %s24_s24  ;;  %s48_s1 = int_to_ptr.vmem [resolvable:$true] %s47_s1 }
  0x1d   :  { %s1546_s26 = scalar_lea.vmem %s25_s24, 128  ;;  %p1551_p11 = scmp.lt.s32.totalorder %s25_s24, %s25_s24 }
  0x1e   :  { %p1547_p10 = scmp.ne.s32.totalorder %s25_s24, %s1546_s26  ;;  %p1552_p12 = scmp.lt.s32.totalorder %s1546_s26, %s1546_s26 }
  0x20   :  { %p1553_p13 = por %p1552_p12, %p1551_p11 }
  0x22   :  { %p1554_p0 = pnand %p1553_p13, %p1547_p10 }
  0x24   :  { %1557 = shalt.err (!%p1554_p0)
}
  0x25   :  { %27 = dma.hbm_to_vmem [thread:$0]  %s1751_s0, 128, %s25_s24, [#allocation3]  }
  0x26   :  { %s1566_s29 = scalar_lea.vmem %s48_s1, 4096  ;;  %p1571_p2 = scmp.lt.s32.totalorder %s48_s1, %s48_s1 }
  0x27   :  { %p1567_p1 = scmp.ne.s32.totalorder %s48_s1, %s1566_s29  ;;  %p1572_p3 = scmp.lt.s32.totalorder %s1566_s29, %s1566_s29 }
  0x29   :  { %p1573_p4 = por %p1572_p3, %p1571_p2 }
  0x2b   :  { %p1574_p5 = pnand %p1573_p4, %p1567_p1 }
  0x2d   :  { %1577 = shalt.err (!%p1574_p5)
}
  0x2e   :  { %53 = dma.hbm_to_vmem [thread:$0]  %s1754_s3, 4096, %s48_s1, [#allocation6], %s1627_s12, %s1627_s12, %s1628_s13  }
  0x2f   :  { %s1634_s10 = smov [#allocation10]  }
  0x30   :  { %s75_s11 = sshll.u32 %s1634_s10, 4  ;;  %s76_s11 = int_to_ptr.vmem [resolvable:$true] %s75_s11 }
  0x31   :  { %s1586_s14 = scalar_lea.vmem %s76_s11, 3072  ;;  %p1591_p7 = scmp.lt.s32.totalorder %s76_s11, %s76_s11 }
  0x32   :  { %p1587_p6 = scmp.ne.s32.totalorder %s76_s11, %s1586_s14  ;;  %p1592_p8 = scmp.lt.s32.totalorder %s1586_s14, %s1586_s14 }
  0x34   :  { %p1593_p9 = por %p1592_p8, %p1591_p7 }
  0x36   :  { %p1594_p10 = pnand %p1593_p9, %p1587_p6 }
  0x38   :  { %1597 = shalt.err (!%p1594_p10)
}
  0x39   :  { %s1635_s0 = smov 64   ;;  %s1636_s15 = smov 4  }
  0x3a   :  { %81 = dma.hbm_to_vmem [thread:$0]  %s1758_s7, 3072, %s76_s11, [#allocation9], %s1635_s0, %s1635_s0, %s1636_s15  }
  0x3b   :  { %1618 = dma.done.wait [#allocation3], 128  }
  0x3c   :  { %1619 = vsyncadd [#allocation3], 4294967168 }
  0x3d   :  { %1620 = dma.done.wait [#allocation6], 4608  }
  0x3e   :  { %1621 = vsyncadd [#allocation6], 4294962688 }
  0x3f   :  { %1622 = dma.done.wait [#allocation9], 9216  }
  0x40   :  { %1623 = vsyncadd [#allocation9], 4294958080  ;;  %v1637_v0 = vmov 0   ;;  %v1356_v1 = vld [vmem:[#allocation5 + $0x14] ss:$8 sps:$4 sm:$0xff]   ;;  %vm138_vm0 = vcmask 261120  }
  0x41   :  { %174 = vmatprep.mubr.bf16.mxu0 %v1637_v0  ;;  %v1358_v2 = vld [vmem:[#allocation5 + $0x10] ss:$8 sps:$4 sm:$0xff]   ;;  %154 = vmatprep.subr.bf16.mxu0 %v1356_v1  ;;  %v1359_v3 = vld [vmem:[#allocation5 + $0x4] ss:$8 sps:$4 sm:$0xff]   ;;  %v1361_v4 = vld [vmem:[#allocation5] ss:$8 sps:$4 sm:$0xff]  }
  0x42   :  { %v100_v5 = vld [vmem:[#allocation2] sm:$0xff]  ;;  %155 = vmatpush1.bf16.msra.mxu0 %v1358_v2  ;;  %v1365_v8 = vld [vmem:[#allocation7 + $0x64] ss:$8 sps:$4 sm:$0xff]   ;;  %v1367_v10 = vld [vmem:[#allocation7 + $0x60] ss:$8 sps:$4 sm:$0xff]   ;;  %vm1639_vm1 = vmmov 0  }
  0x43   :  { %v1362_v6 = vld [vmem:[#allocation7 + $0x74] ss:$8 sps:$4 sm:$0xff]   ;;  %156 = vmatprep.subr.bf16.mxu0 %v1359_v3  ;;  %v1364_v7 = vld [vmem:[#allocation7 + $0x70] ss:$8 sps:$4 sm:$0xff]   ;;  %v101_v9 = vpack.c.bf16 %v100_v5, %v100_v5  ;;  %v1371_v13 = vld [vmem:[#allocation7 + $0x44] ss:$8 sps:$4 sm:$0xff]  }
  0x44   :  { %391 = vmatprep.subr.bf16.mxu1 %v1362_v6  ;;  %v1368_v11 = vld [vmem:[#allocation7 + $0x54] ss:$8 sps:$4 sm:$0xff]   ;;  %v1370_v12 = vld [vmem:[#allocation7 + $0x50] ss:$8 sps:$4 sm:$0xff]   ;;  %v1373_v14 = vld [vmem:[#allocation7 + $0x40] ss:$8 sps:$4 sm:$0xff]  }
  0x45   :  { %392 = vmatpush1.bf16.msra.mxu1 %v1364_v7  ;;  %v1374_v15 = vld [vmem:[#allocation7 + $0x34] ss:$8 sps:$4 sm:$0xff]   ;;  %v1376_v16 = vld [vmem:[#allocation7 + $0x30] ss:$8 sps:$4 sm:$0xff]   ;;  %v1377_v17 = vld [vmem:[#allocation7 + $0x24] ss:$8 sps:$4 sm:$0xff]  }
  0x46   :  { %157 = vmatpush1.bf16.msra.mxu0 %v1361_v4  ;;  %393 = vmatprep.subr.bf16.mxu1 %v1365_v8  ;;  %v1379_v18 = vld [vmem:[#allocation7 + $0x20] ss:$8 sps:$4 sm:$0xff]   ;;  %v1380_v19 = vld [vmem:[#allocation7 + $0x14] ss:$8 sps:$4 sm:$0xff]   ;;  %v1382_v20 = vld [vmem:[#allocation7 + $0x10] ss:$8 sps:$4 sm:$0xff]   ;;  %v108_v4 = vlaneseq }
  0x47   :  { %v1383_v21 = vld [vmem:[#allocation7 + $0x4] ss:$8 sps:$4 sm:$0xff]   ;;  %v1385_v22 = vld [vmem:[#allocation7] ss:$8 sps:$4 sm:$0xff]   ;;  %v1386_v23 = vld [vmem:[#allocation7 + $0xf4] ss:$8 sps:$4 sm:$0xff]  }
  0x48   :  { %v1388_v24 = vld [vmem:[#allocation7 + $0xf0] ss:$8 sps:$4 sm:$0xff]   ;;  %v1389_v25 = vld [vmem:[#allocation7 + $0xe4] ss:$8 sps:$4 sm:$0xff]   ;;  %v1391_v26 = vld [vmem:[#allocation7 + $0xe0] ss:$8 sps:$4 sm:$0xff]  }
  0x49   :  { %1162 = vmatmul.mubr.msk.bf16.vlgmr.msra.gmra.mxu0 %vm138_vm0, %v101_v9  ;;  %394 = vmatpush1.bf16.msra.mxu1 %v1367_v10  ;;  %v1392_v27 = vld [vmem:[#allocation7 + $0xd4] ss:$8 sps:$4 sm:$0xff]   ;;  %v1394_v28 = vld [vmem:[#allocation7 + $0xd0] ss:$8 sps:$4 sm:$0xff]   ;;  %v1395_v29 = vld [vmem:[#allocation7 + $0xc4] ss:$8 sps:$4 sm:$0xff]  }
  0x4a   :  { %395 = vmatprep.subr.bf16.mxu1 %v1368_v11  ;;  %v1397_v30 = vld [vmem:[#allocation7 + $0xc0] ss:$8 sps:$4 sm:$0xff]   ;;  %v1398_v31 = vld [vmem:[#allocation7 + $0xb4] ss:$8 sps:$4 sm:$0xff]   ;;  %v1400_v32 = vld [vmem:[#allocation7 + $0xb0] ss:$8 sps:$4 sm:$0xff]  }
  0x4b   :  { %v1401_v33 = vld [vmem:[#allocation7 + $0xa4] ss:$8 sps:$4 sm:$0xff]   ;;  %v1403_v34 = vld [vmem:[#allocation7 + $0xa0] ss:$8 sps:$4 sm:$0xff]   ;;  %v1404_v35 = vld [vmem:[#allocation7 + $0x94] ss:$8 sps:$4 sm:$0xff]  }
  0x4c   :  { %v1406_v36 = vld [vmem:[#allocation7 + $0x90] ss:$8 sps:$4 sm:$0xff]   ;;  %v1407_v37 = vld [vmem:[#allocation7 + $0x84] ss:$8 sps:$4 sm:$0xff]   ;;  %v1409_v38 = vld [vmem:[#allocation7 + $0x80] ss:$8 sps:$4 sm:$0xff]  }
  0x4d   :  { %396 = vmatpush1.bf16.msra.mxu1 %v1370_v12  ;;  %v1410_v39 = vld [vmem:[#allocation8 + $0xa8] ss:$12 sps:$4 sm:$0xff]   ;;  %v1412_v40 = vld [vmem:[#allocation8 + $0xac] ss:$12 sps:$4 sm:$0xff]   ;;  %v1413_v42 = vld [vmem:[#allocation8 + $0x90] ss:$12 sps:$4 sm:$0xff]  }
  0x4e   :  { %397 = vmatprep.subr.bf16.mxu1 %v1371_v13  ;;  %v1415_v41 = vld [vmem:[#allocation8 + $0x94] ss:$12 sps:$4 sm:$0xff]   ;;  %773 = vmatprep.subr.bf16.mxu0 %v1412_v40  ;;  %v1418_v43 = vld [vmem:[#allocation8 + $0x7c] ss:$12 sps:$4 sm:$0xff]   ;;  %v1416_v45 = vld [vmem:[#allocation8 + $0x78] ss:$12 sps:$4 sm:$0xff]  }
  0x4f   :  { %774 = vmatpush1.bf16.msra.mxu0 %v1410_v39  ;;  %v1437_v44 = vld [vmem:[#allocation8 + $0x170] ss:$12 sps:$4 sm:$0xff]   ;;  %v1419_v47 = vld [vmem:[#allocation8 + $0x60] ss:$12 sps:$4 sm:$0xff]   ;;  %v1422_v49 = vld [vmem:[#allocation8 + $0x48] ss:$12 sps:$4 sm:$0xff]  }
  0x50   :  { %775 = vmatprep.subr.bf16.mxu0 %v1415_v41  ;;  %v1421_v46 = vld [vmem:[#allocation8 + $0x64] ss:$12 sps:$4 sm:$0xff]   ;;  %v1424_v48 = vld [vmem:[#allocation8 + $0x4c] ss:$12 sps:$4 sm:$0xff]   ;;  %v1427_v50 = vld [vmem:[#allocation8 + $0x34] ss:$12 sps:$4 sm:$0xff]  }
  0x51   :  { %398 = vmatpush1.bf16.msra.mxu1 %v1373_v14  ;;  %v1425_v51 = vld [vmem:[#allocation8 + $0x30] ss:$12 sps:$4 sm:$0xff]   ;;  %v1428_v53 = vld [vmem:[#allocation8 + $0x18] ss:$12 sps:$4 sm:$0xff]   ;;  %v1431_v55 = vld [vmem:[#allocation8] ss:$12 sps:$4 sm:$0xff]  }
  0x52   :  { %399 = vmatprep.subr.bf16.mxu1 %v1374_v15  ;;  %v1430_v52 = vld [vmem:[#allocation8 + $0x1c] ss:$12 sps:$4 sm:$0xff]   ;;  %v1433_v54 = vld [vmem:[#allocation8 + $0x4] ss:$12 sps:$4 sm:$0xff]   ;;  %v1436_v56 = vld [vmem:[#allocation8 + $0x16c] ss:$12 sps:$4 sm:$0xff]  }
  0x53   :  { %776 = vmatpush1.bf16.msra.mxu0 %v1413_v42  ;;  %v1434_v57 = vld [vmem:[#allocation8 + $0x168] ss:$12 sps:$4 sm:$0xff]   ;;  %v1439_v59 = vld [vmem:[#allocation8 + $0x150] ss:$12 sps:$4 sm:$0xff]   ;;  %v1444_v61 = vld [vmem:[#allocation8 + $0x138] ss:$12 sps:$4 sm:$0xff]  }
  0x54   :  { %777 = vmatprep.subr.bf16.mxu0 %v1418_v43  ;;  %v1441_v58 = vld [vmem:[#allocation8 + $0x154] ss:$12 sps:$4 sm:$0xff]   ;;  %v1446_v60 = vld [vmem:[#allocation8 + $0x13c] ss:$12 sps:$4 sm:$0xff]   ;;  %v1451_v62 = vld [vmem:[#allocation8 + $0x124] ss:$12 sps:$4 sm:$0xff]  }
  0x55   :  { %400 = vmatpush1.bf16.msra.mxu1 %v1376_v16  ;;  %v1449_v63 = vld [vmem:[#allocation8 + $0x120] ss:$12 sps:$4 sm:$0xff]   ;;  %v1454_v1 = vld [vmem:[#allocation8 + $0x108] ss:$12 sps:$4 sm:$0xff]   ;;  %v1459_v3 = vld [vmem:[#allocation8 + $0xf0] ss:$12 sps:$4 sm:$0xff]  }
  0x56   :  { %401 = vmatprep.subr.bf16.mxu1 %v1377_v17  ;;  %v1456_v0 = vld [vmem:[#allocation8 + $0x10c] ss:$12 sps:$4 sm:$0xff]   ;;  %v1461_v2 = vld [vmem:[#allocation8 + $0xf4] ss:$12 sps:$4 sm:$0xff]   ;;  %v1712_v5 = vshrl.u32 %v108_v4, 7  ;;  %v1638_v41 = vmov 0.0  }
  0x57   :  { %778 = vmatpush1.bf16.msra.mxu0 %v1416_v45  ;;  %v106_v7 = vld [vmem:[%s1753_s2] sm:$0x3]  ;;  %v1473_v39 = vld [vmem:[#allocation8 + $0x8] ss:$12 sps:$4 sm:$0xff]   ;;  %s1640_s19 = smov [#allocation11]  }
  0x58   :  { %779 = vmatprep.subr.bf16.mxu0 %v1421_v46  ;;  %v1715_v6 = vsub.s32 0, %v1712_v5  ;;  %v1721_v8 = vsub.s32 1, %v1712_v5  ;;  %v1474_v40 = vld [vmem:[#allocation10 + $0x78] sm:$0xff]   ;;  %s1147_s20 = sshll.u32 %s1640_s19, 4  ;;  %s1148_s20 = int_to_ptr.vmem [resolvable:$true] %s1147_s20 }
  0x59   :  { %402 = vmatpush1.bf16.msra.mxu1 %v1379_v18  ;;  %v219_v42 = vld [vmem:[%s1755_s4] sm:$0x3]  ;;  %s1598_s21 = scalar_lea.vmem %s1148_s20, 64  ;;  %p1603_p12 = scmp.lt.s32.totalorder %s1148_s20, %s1148_s20 }
  0x5a   :  { %403 = vmatprep.subr.bf16.mxu1 %v1380_v19  ;;  %v111_v9 = vrot.slane %v106_v7, %v1715_v6  ;;  %v115_v10 = vrot.slane %v106_v7, %v1721_v8  ;;  %v224_v43 = vrot.slane %v219_v42, %v1715_v6  ;;  %v1488_v4 = vld [vmem:[#allocation10 + $0x98] sm:$0xff]   ;;  %v1489_v7 = vld [vmem:[#allocation10 + $0x50] sm:$0xff]   ;;  %p1599_p11 = scmp.ne.s32.totalorder %s1148_s20, %s1598_s21  ;;  %p1604_p13 = scmp.lt.s32.totalorder %s1598_s21, %s1598_s21 }
  0x5b   :  { %780 = vmatpush1.bf16.msra.mxu0 %v1419_v47 }
  0x5c   :  { %781 = vmatprep.subr.bf16.mxu0 %v1424_v48  ;;  %p1605_p0 = por %p1604_p13, %p1603_p12 }
  0x5d   :  { %404 = vmatpush1.bf16.msra.mxu1 %v1382_v20  ;;  %v1438_v20 = vld [vmem:[#allocation8 + $0xb0] ss:$12 sps:$4 sm:$0xff]  }
  0x5e   :  { %405 = vmatprep.subr.bf16.mxu1 %v1383_v21  ;;  %p1606_p1 = pnand %p1605_p0, %p1599_p11 }
  0x5f   :  { %782 = vmatpush1.bf16.msra.mxu0 %v1422_v49 }
  0x60   :  { %783 = vmatprep.subr.bf16.mxu0 %v1427_v50 }
  0x61   :  { %406 = vmatpush1.bf16.msra.mxu1 %v1385_v22  ;;  %v1442_v22 = vld [vmem:[#allocation8 + $0x158] ss:$12 sps:$4 sm:$0xff]  }
  0x62   :  { %407 = vmatprep.subr.bf16.mxu1 %v1386_v23  ;;  %v1443_v23 = vld [vmem:[#allocation8 + $0x98] ss:$12 sps:$4 sm:$0xff]  }
  0x63   :  { %784 = vmatpush1.bf16.msra.mxu0 %v1425_v51 }
  0x64   :  { %785 = vmatprep.subr.bf16.mxu0 %v1430_v52 }
  0x65   :  { %408 = vmatpush2.bf16.msra.mxu1 %v1388_v24  ;;  %v1447_v24 = vld [vmem:[#allocation8 + $0x140] ss:$12 sps:$4 sm:$0xff]  }
  0x66   :  { %409 = vmatprep.subr.bf16.mxu1 %v1389_v25  ;;  %v1448_v25 = vld [vmem:[#allocation8 + $0x80] ss:$12 sps:$4 sm:$0xff]  }
  0x67   :  { %786 = vmatpush1.bf16.msra.mxu0 %v1428_v53 }
  0x68   :  { %787 = vmatprep.subr.bf16.mxu0 %v1433_v54  ;;  %v1475_v54 = vld [vmem:[#allocation10 + $0x38] sm:$0xff]  }
  0x69   :  { %410 = vmatpush2.bf16.msra.mxu1 %v1391_v26  ;;  %v1452_v26 = vld [vmem:[#allocation8 + $0x128] ss:$12 sps:$4 sm:$0xff]  }
  0x6a   :  { %411 = vmatprep.subr.bf16.mxu1 %v1392_v27  ;;  %v1453_v27 = vld [vmem:[#allocation8 + $0x68] ss:$12 sps:$4 sm:$0xff]  }
  0x6b   :  { %788 = vmatpush1.bf16.msra.mxu0 %v1431_v55  ;;  %v1476_v55 = vld [vmem:[#allocation10 + $0xb8] sm:$0xff]  }
  0x6c   :  { %789 = vmatprep.subr.bf16.mxu0 %v1436_v56 }
  0x6d   :  { %412 = vmatpush2.bf16.msra.mxu1 %v1394_v28  ;;  %v1457_v28 = vld [vmem:[#allocation8 + $0x110] ss:$12 sps:$4 sm:$0xff]  }
  0x6e   :  { %413 = vmatprep.subr.bf16.mxu1 %v1395_v29  ;;  %v1458_v29 = vld [vmem:[#allocation8 + $0x50] ss:$12 sps:$4 sm:$0xff]  }
  0x6f   :  { %790 = vmatpush2.bf16.msra.mxu0 %v1434_v57  ;;  %v1477_v57 = vld [vmem:[#allocation10 + $0x70] sm:$0xff]  }
  0x70   :  { %791 = vmatprep.subr.bf16.mxu0 %v1441_v58  ;;  %v1478_v58 = vld [vmem:[#allocation10 + $0x30] sm:$0xff]  }
  0x71   :  { %414 = vmatpush2.bf16.msra.mxu1 %v1397_v30  ;;  %v1462_v30 = vld [vmem:[#allocation8 + $0xf8] ss:$12 sps:$4 sm:$0xff]  }
  0x72   :  { %415 = vmatprep.subr.bf16.mxu1 %v1398_v31  ;;  %v1463_v31 = vld [vmem:[#allocation8 + $0x38] ss:$12 sps:$4 sm:$0xff]  }
  0x73   :  { %792 = vmatpush2.bf16.msra.mxu0 %v1439_v59  ;;  %v1479_v59 = vld [vmem:[#allocation10 + $0xb0] sm:$0xff]  }
  0x74   :  { %793 = vmatprep.subr.bf16.mxu0 %v1446_v60  ;;  %v1480_v60 = vld [vmem:[#allocation10 + $0x68] sm:$0xff]  }
  0x75   :  { %416 = vmatpush2.bf16.msra.mxu1 %v1400_v32  ;;  %v1466_v32 = vld [vmem:[#allocation8 + $0xdc] ss:$12 sps:$4 sm:$0xff]  }
  0x76   :  { %417 = vmatprep.subr.bf16.mxu1 %v1401_v33  ;;  %v1467_v33 = vld [vmem:[#allocation8 + $0xe0] ss:$12 sps:$4 sm:$0xff]  }
  0x77   :  { %794 = vmatpush2.bf16.msra.mxu0 %v1444_v61  ;;  %v1481_v61 = vld [vmem:[#allocation10 + $0x28] sm:$0xff]  }
  0x78   :  { %795 = vmatprep.subr.bf16.mxu0 %v1451_v62  ;;  %v1482_v62 = vld [vmem:[#allocation10 + $0xa8] sm:$0xff]  }
  0x79   :  { %418 = vmatpush2.bf16.msra.mxu1 %v1403_v34  ;;  %v1464_v34 = vld [vmem:[#allocation8 + $0xd8] ss:$12 sps:$4 sm:$0xff]  }
  0x7a   :  { %419 = vmatprep.subr.bf16.mxu1 %v1404_v35  ;;  %v1468_v35 = vld [vmem:[#allocation8 + $0x20] ss:$12 sps:$4 sm:$0xff]  }
  0x7b   :  { %796 = vmatpush2.bf16.msra.mxu0 %v1449_v63  ;;  %v1483_v63 = vld [vmem:[#allocation10 + $0x60] sm:$0xff]  }
  0x7c   :  { %797 = vmatprep.subr.bf16.mxu0 %v1456_v0  ;;  %v1484_v0 = vld [vmem:[#allocation10 + $0x20] sm:$0xff]  }
  0x7d   :  { %420 = vmatpush2.bf16.msra.mxu1 %v1406_v36  ;;  %v1471_v36 = vld [vmem:[#allocation8 + $0xc4] ss:$12 sps:$4 sm:$0xff]  }
  0x7e   :  { %421 = vmatprep.subr.bf16.mxu1 %v1407_v37  ;;  %v1472_v37 = vld [vmem:[#allocation8 + $0xc8] ss:$12 sps:$4 sm:$0xff]  }
  0x7f   :  { %798 = vmatpush2.bf16.msra.mxu0 %v1454_v1  ;;  %v1485_v1 = vld [vmem:[#allocation10 + $0xa0] sm:$0xff]  }
  0x80   :  { %799 = vmatprep.subr.bf16.mxu0 %v1461_v2  ;;  %v1486_v2 = vld [vmem:[#allocation10 + $0x58] sm:$0xff]  }
  0x81   :  { %422 = vmatpush2.bf16.msra.mxu1 %v1409_v38  ;;  %v1469_v38 = vld [vmem:[#allocation8 + $0xc0] ss:$12 sps:$4 sm:$0xff]  }
  0x82   :  { %1268 = vmatprep.subr.bf16.mxu1 %v1437_v44  ;;  %v228_v44 = vrot.slane %v219_v42, %v1721_v8 }
  0x83   :  { %800 = vmatpush2.bf16.msra.mxu0 %v1459_v3  ;;  %v1487_v3 = vld [vmem:[#allocation10 + $0x18] sm:$0xff]  }
  0x84   :  { %801 = vmatprep.subr.bf16.mxu0 %v1466_v32 }
  0x87   :  { %802 = vmatpush2.bf16.msra.mxu0 %v1464_v34 }
  0x88   :  { %803 = vmatprep.subr.bf16.mxu0 %v1471_v36 }
  0x8b   :  { %804 = vmatpush2.bf16.msra.mxu0 %v1469_v38 }
  0x8c   :  { %1290 = vmatprep.subr.bf16.mxu0 %v1474_v40 }
 0x109   :  { %v176_v11 = vpop.f32.mrf.mxu0 }
 0x10a   :  { %v177_v12 = vadd.f32 %v176_v11, %v111_v9  ;;  %v1490_v9 = vld [vmem:[#allocation10 + $0x10] sm:$0xff]   ;;  %v1492_v11 = vld [vmem:[#allocation10 + $0x48] sm:$0xff]  }
 0x10b   :  { %v178_v13 = vpop.f32.mrf.mxu0 }
 0x10c   :  { %v179_v14 = vadd.f32 %v178_v13, %v115_v10  ;;  %v183_v15 = vmax.f32 %v177_v12, 0.0  ;;  %v1491_v10 = vld [vmem:[#allocation10 + $0x90] sm:$0xff]   ;;  %v1493_v12 = vld [vmem:[#allocation10 + $0x8] sm:$0xff]  }
 0x10d   :  { %v180_v16 = vpop.f32.mrf.mxu0  ;;  %v1494_v13 = vld [vmem:[#allocation10 + $0x88] sm:$0xff]  }
 0x10e   :  { %v184_v17 = vmax.f32 %v179_v14, 0.0  ;;  %v185_v21 = vpack.c.bf16 %v183_v15, %v183_v15  ;;  %v1495_v14 = vld [vmem:[#allocation10 + $0x40] sm:$0xff]  }
 0x10f   :  { %v181_v18 = vpop.f32.mrf.mxu0  ;;  %v1496_v15 = vld [vmem:[#allocation10] sm:$0xff]  }
 0x110   :  { %v186_v19 = vpack.c.bf16 %v184_v17, %v184_v17  ;;  %v1497_v16 = vld [vmem:[#allocation10 + $0x80] sm:$0xff]   ;;  %v500_v17 = vld [vmem:[%s1757_s6] sm:$0x7] }
 0x111   :  { %v505_v18 = vrot.slane %v500_v17, %v1715_v6 }
 0x112   :  { %423 = vmatprep.mubr.bf16.mxu1 %v186_v19  ;;  %v512_v19 = vsub.s32 2, %v1712_v5 }
 0x113   :  { %424 = vmatmul.mubr.bf16.vlgmr.msra.gmra.mxu1 %v185_v21 }
 0x114   :  { %1269 = vmatpush3.bf16.msra.mxu1 %v1438_v20  ;;  %v509_v20 = vrot.slane %v500_v17, %v1721_v8 }
 0x115   :  { %1270 = vmatprep.subr.bf16.mxu1 %v1442_v22 }
 0x118   :  { %1271 = vmatpush3.bf16.msra.mxu1 %v1443_v23 }
 0x119   :  { %1272 = vmatprep.subr.bf16.mxu1 %v1447_v24  ;;  %v513_v24 = vrot.slane %v500_v17, %v512_v19 }
 0x11c   :  { %1273 = vmatpush3.bf16.msra.mxu1 %v1448_v25 }
 0x11d   :  { %1274 = vmatprep.subr.bf16.mxu1 %v1452_v26 }
 0x120   :  { %1275 = vmatpush3.bf16.msra.mxu1 %v1453_v27 }
 0x121   :  { %1276 = vmatprep.subr.bf16.mxu1 %v1457_v28 }
 0x124   :  { %1277 = vmatpush3.bf16.msra.mxu1 %v1458_v29 }
 0x125   :  { %1278 = vmatprep.subr.bf16.mxu1 %v1462_v30 }
 0x128   :  { %1279 = vmatpush3.bf16.msra.mxu1 %v1463_v31 }
 0x129   :  { %1280 = vmatprep.subr.bf16.mxu1 %v1467_v33 }
 0x12c   :  { %1281 = vmatpush3.bf16.msra.mxu1 %v1468_v35 }
 0x12d   :  { %1282 = vmatprep.subr.bf16.mxu1 %v1472_v37 }
 0x130   :  { %1283 = vmatpush3.bf16.msra.mxu1 %v1473_v39  ;;  %v1243_v39 = vld [vmem:[%s1759_s8] ss:$0 sm:$0xff] }
 0x131   :  { %1321 = vmatprep.subr.bf16.mxu1 %v1638_v41 }
 0x1d3   :  { %v425_v45 = vpop.f32.mrf.mxu1 }
 0x1d4   :  { %v426_v46 = vadd.f32 %v425_v45, %v224_v43 }
 0x1d5   :  { %v427_v47 = vpop.f32.mrf.mxu1 }
 0x1d6   :  { %v428_v48 = vadd.f32 %v427_v47, %v228_v44  ;;  %v432_v49 = vmax.f32 %v426_v46, 0.0 }
 0x1d7   :  { %v429_v50 = vpop.f32.mrf.mxu1 }
 0x1d8   :  { %v433_v51 = vmax.f32 %v428_v48, 0.0  ;;  %v434_v56 = vpack.c.bf16 %v432_v49, %v432_v49 }
 0x1d9   :  { %v430_v52 = vpop.f32.mrf.mxu1 }
 0x1da   :  { %v435_v53 = vpack.c.bf16 %v433_v51, %v433_v51 }
 0x1dc   :  { %805 = vmatprep.mubr.bf16.mxu0 %v435_v53  ;;  %846 = vmatprep.mubr.bf16.mxu1 %v435_v53 }
 0x1dd   :  { %806 = vmatmul.mubr.bf16.vlgmr.msra.gmra.mxu0 %v434_v56  ;;  %847 = vmatmul.mubr.bf16.vlgmr.msra.gmra.mxu1 %v434_v56 }
 0x1de   :  { %1291 = vmatpush3.bf16.msra.mxu0 %v1475_v54  ;;  %1322 = vmatpush3.bf16.msra.mxu1 %v1476_v55 }
 0x1df   :  { %1292 = vmatprep.subr.bf16.mxu0 %v1477_v57  ;;  %1323 = vmatprep.subr.bf16.mxu1 %v1638_v41 }
 0x1e0   :  { %1337 = vmatprep.mubr.msk.bf16.mxu1 %vm1639_vm1, %v1638_v41 }
 0x1e2   :  { %1293 = vmatpush3.bf16.msra.mxu0 %v1478_v58  ;;  %1324 = vmatpush3.bf16.msra.mxu1 %v1479_v59 }
 0x1e3   :  { %1294 = vmatprep.subr.bf16.mxu0 %v1480_v60  ;;  %1325 = vmatprep.subr.bf16.mxu1 %v1638_v41 }
 0x1e6   :  { %1295 = vmatpush3.bf16.msra.mxu0 %v1481_v61  ;;  %1326 = vmatpush3.bf16.msra.mxu1 %v1482_v62 }
 0x1e7   :  { %1296 = vmatprep.subr.bf16.mxu0 %v1483_v63  ;;  %1327 = vmatprep.subr.bf16.mxu1 %v1638_v41 }
 0x1ea   :  { %1297 = vmatpush3.bf16.msra.mxu0 %v1484_v0  ;;  %1328 = vmatpush3.bf16.msra.mxu1 %v1485_v1 }
 0x1eb   :  { %1298 = vmatprep.subr.bf16.mxu0 %v1486_v2  ;;  %1329 = vmatprep.subr.bf16.mxu1 %v1638_v41 }
 0x1ee   :  { %1299 = vmatpush3.bf16.msra.mxu0 %v1487_v3  ;;  %1330 = vmatpush3.bf16.msra.mxu1 %v1488_v4 }
 0x1ef   :  { %1300 = vmatprep.subr.bf16.mxu0 %v1489_v7  ;;  %1331 = vmatprep.subr.bf16.mxu1 %v1638_v41 }
 0x1f2   :  { %1301 = vmatpush3.bf16.msra.mxu0 %v1490_v9  ;;  %1332 = vmatpush3.bf16.msra.mxu1 %v1491_v10 }
 0x1f3   :  { %1333 = vmatprep.subr.bf16.mxu1 %v1638_v41  ;;  %1302 = vmatprep.subr.bf16.mxu0 %v1492_v11 }
 0x1f6   :  { %1303 = vmatpush3.bf16.msra.mxu0 %v1493_v12  ;;  %1334 = vmatpush3.bf16.msra.mxu1 %v1494_v13 }
 0x1f7   :  { %1335 = vmatprep.subr.bf16.mxu1 %v1638_v41  ;;  %1304 = vmatprep.subr.bf16.mxu0 %v1495_v14 }
 0x1fa   :  { %1305 = vmatpush3.bf16.msra.mxu0 %v1496_v15  ;;  %1336 = vmatpush3.bf16.msra.mxu1 %v1497_v16 }
 0x29d   :  { %v807_v21 = vpop.f32.mrf.mxu0  ;;  %v1284_v22 = vpop.f32.mrf.mxu1 }
 0x29e   :  { %v808_v23 = vadd.f32 %v807_v21, %v505_v18 }
 0x29f   :  { %v809_v25 = vpop.f32.mrf.mxu0  ;;  %v1285_v26 = vpop.f32.mrf.mxu1 }
 0x2a0   :  { %v810_v27 = vadd.f32 %v809_v25, %v509_v20  ;;  %v1286_v28 = vadd.f32 %v1285_v26, %v1284_v22  ;;  %v854_v29 = vmax.f32 %v808_v23, 0.0 }
 0x2a1   :  { %v811_v30 = vpop.f32.mrf.mxu0  ;;  %v1287_v31 = vpop.f32.mrf.mxu1 }
 0x2a2   :  { %v855_v32 = vmax.f32 %v810_v27, 0.0  ;;  %v849_v33 = vadd.f32 %v1286_v28, %v513_v24  ;;  %v857_v5 = vpack.c.bf16 %v854_v29, %v854_v29 }
 0x2a3   :  { %v812_v34 = vpop.f32.mrf.mxu0  ;;  %v1288_v35 = vpop.f32.mrf.mxu1 }
 0x2a4   :  { %v858_v6 = vpack.c.bf16 %v855_v32, %v855_v32  ;;  %v856_v36 = vmax.f32 %v849_v33, 0.0 }
 0x2a6   :  { %v859_v37 = vpack.c.bf16 %v856_v36, %v856_v36  ;;  %1091 = vmatprep.mubr.bf16.mxu0 %v858_v6 }
 0x2a7   :  { %1092 = vmatmul.mubr.bf16.vlgmr.msra.gmra.mxu0 %v857_v5 }
 0x2a8   :  { %1338 = vmatmul.mubr.bf16.vlgmr.msra.gmra.mxu1 %v859_v37 }
 0x367   :  { %v1306_v8 = vpop.f32.mrf.mxu0 }
 0x368   :  { %v1133_v38 = vpop.f32.mrf.mxu1 }
 0x369   :  { %v1307_v40 = vpop.f32.mrf.mxu0 }
 0x36a   :  { %v1308_v41 = vadd.f32 %v1307_v40, %v1306_v8  ;;  %v1339_v42 = vpop.f32.mrf.mxu1 }
 0x36b   :  { %v1309_v43 = vpop.f32.mrf.mxu0 }
 0x36c   :  { %v1094_v44 = vadd.f32 %v1308_v41, %v1243_v39  ;;  %v1136_v45 = vpop.f32.mrf.mxu1 }
 0x36d   :  { %v1310_v46 = vpop.f32.mrf.mxu0 }
 0x36e   :  { %v1340_v47 = vpop.f32.mrf.mxu1  ;;  %v1134_v48 = vadd.f32 %v1133_v38, %v1094_v44 }
 0x370   :  { %v1139_v49 = vpack.c.bf16 %v1134_v48, %v1134_v48 }
 0x372   :  { %1140 = vst [vmem:[#allocation11] sm:$0xf] %v1139_v49 }
 0x373   :  { %1609 = shalt.err (!%p1606_p1)
}
 0x374   :  { %1150 = dma.vmem_to_hbm [thread:$0]  %s1148_s20, 64, %s1760_s9, [#allocation4]  }
 0x375   :  { %1624 = dma.done.wait [#allocation4], 64  }
 0x376   :  { %1625 = vsyncadd [#allocation4], 4294967232 }
 0x377   :  { %1154 = vsyncpa [#allocation3], 1 }
 0x378   :  { %1155 = vsyncpa [#allocation6], 1 }
 0x379   :  { %1156 = vsyncpa [#allocation9], 1 }
 0x37a   :  { %1157 = vsyncpa [#allocation4], 1 }

// kernel: tpu_custom_call.1
= control target key start
LH: loop header
LB: loop body
LE: loop exit
PB: predicated region body
PF: predicated region fallthrough
CT: control target
= control target key end

     0   :  { %14 = vsyncpa [#allocation3], 0  ;;  %s1751_s0 = inlined_call_operand.hbm [shape: f32[8,32], index: 0, kind: input, shape index: {}]   ;;  %s1752_s1 = inlined_call_operand.hbm [shape: bf16[32,256], index: 1, kind: input, shape index: {}]   ;;  %s1753_s2 = inlined_call_operand.vmem [shape: f32[1,256], index: 2, kind: input, shape index: {}]   ;;  %s1754_s3 = inlined_call_operand.hbm [shape: bf16[256,256], index: 3, kind: input, shape index: {}]   ;;  %s1755_s4 = inlined_call_operand.vmem [shape: f32[1,256], index: 4, kind: input, shape index: {}]   ;;  %s1756_s5 = inlined_call_operand.hbm [shape: bf16[256,384], index: 5, kind: input, shape index: {}]   ;;  %s1757_s6 = inlined_call_operand.vmem [shape: f32[1,384], index: 6, kind: input, shape index: {}]   ;;  %s1758_s7 = inlined_call_operand.hbm [shape: bf16[384,128], index: 7, kind: input, shape index: {}]   ;;  %s1759_s8 = inlined_call_operand.vmem [shape: f32[1,128], index: 8, kind: input, shape index: {}]   ;;  %s1760_s9 = inlined_call_operand.hbm [shape: bf16[8,128], index: 9, kind: output, shape index: {}]  }
   0x1   :  { %15 = vsyncpa [#allocation6], 0 }
   0x2   :  { %16 = vsyncpa [#allocation9], 0 }
   0x3   :  { %17 = vsyncpa [#allocation4], 0  ;;  %s1626_s30 = smov [#allocation5]  }
   0x4   :  { %s33_s10 = sshll.u32 %s1626_s30, 4  ;;  %s34_s10 = int_to_ptr.vmem [resolvable:$true] %s33_s10 }
   0x5   :  { %s1506_s11 = scalar_lea.vmem %s34_s10, 512  ;;  %p1511_p1 = scmp.lt.s32.totalorder %s34_s10, %s34_s10 }
   0x6   :  { %p1507_p0 = scmp.ne.s32.totalorder %s34_s10, %s1506_s11  ;;  %p1512_p2 = scmp.lt.s32.totalorder %s1506_s11, %s1506_s11 }
   0x8   :  { %p1513_p3 = por %p1512_p2, %p1511_p1 }
   0xa   :  { %p1514_p4 = pnand %p1513_p3, %p1507_p0 }
   0xc   :  { %1517 = shalt.err (!%p1514_p4)
}
   0xd   :  { %s1627_s12 = smov 128   ;;  %s1628_s13 = smov 8  }
   0xe   :  { %39 = dma.hbm_to_vmem [thread:$0]  %s1752_s1, 512, %s34_s10, [#allocation6], %s1627_s12, %s1627_s12, %s1628_s13  }
   0xf   :  { %s1629_s16 = smov [#allocation8]  }
  0x10   :  { %s61_s17 = sshll.u32 %s1629_s16, 4  ;;  %s62_s17 = int_to_ptr.vmem [resolvable:$true] %s61_s17 }
  0x11   :  { %s1526_s18 = scalar_lea.vmem %s62_s17, 6144  ;;  %p1531_p6 = scmp.lt.s32.totalorder %s62_s17, %s62_s17 }
  0x12   :  { %p1527_p5 = scmp.ne.s32.totalorder %s62_s17, %s1526_s18  ;;  %p1532_p7 = scmp.lt.s32.totalorder %s1526_s18, %s1526_s18 }
  0x14   :  { %p1533_p8 = por %p1532_p7, %p1531_p6 }
  0x16   :  { %p1534_p9 = pnand %p1533_p8, %p1527_p5 }
  0x18   :  { %1537 = shalt.err (!%p1534_p9)
}
  0x19   :  { %s1630_s19 = smov 192   ;;  %s1631_s20 = smov 12  }
  0x1a   :  { %67 = dma.hbm_to_vmem [thread:$0]  %s1756_s5, 6144, %s62_s17, [#allocation9], %s1630_s19, %s1630_s19, %s1631_s20  }
  0x1b   :  { %s1632_s23 = smov [#allocation2]   ;;  %s1633_s25 = smov [#allocation7]  }
  0x1c   :  { %s24_s24 = sshll.u32 %s1632_s23, 4  ;;  %s47_s1 = sshll.u32 %s1633_s25, 4  ;;  %s25_s24 = int_to_ptr.vmem [resolvable:$true] %s24_s24  ;;  %s48_s1 = int_to_ptr.vmem [resolvable:$true] %s47_s1 }
  0x1d   :  { %s1546_s26 = scalar_lea.vmem %s25_s24, 128  ;;  %p1551_p11 = scmp.lt.s32.totalorder %s25_s24, %s25_s24 }
  0x1e   :  { %p1547_p10 = scmp.ne.s32.totalorder %s25_s24, %s1546_s26  ;;  %p1552_p12 = scmp.lt.s32.totalorder %s1546_s26, %s1546_s26 }
  0x20   :  { %p1553_p13 = por %p1552_p12, %p1551_p11 }
  0x22   :  { %p1554_p0 = pnand %p1553_p13, %p1547_p10 }
  0x24   :  { %1557 = shalt.err (!%p1554_p0)
}
  0x25   :  { %27 = dma.hbm_to_vmem [thread:$0]  %s1751_s0, 128, %s25_s24, [#allocation3]  }
  0x26   :  { %s1566_s29 = scalar_lea.vmem %s48_s1, 4096  ;;  %p1571_p2 = scmp.lt.s32.totalorder %s48_s1, %s48_s1 }
  0x27   :  { %p1567_p1 = scmp.ne.s32.totalorder %s48_s1, %s1566_s29  ;;  %p1572_p3 = scmp.lt.s32.totalorder %s1566_s29, %s1566_s29 }
  0x29   :  { %p1573_p4 = por %p1572_p3, %p1571_p2 }
  0x2b   :  { %p1574_p5 = pnand %p1573_p4, %p1567_p1 }
  0x2d   :  { %1577 = shalt.err (!%p1574_p5)
}
  0x2e   :  { %53 = dma.hbm_to_vmem [thread:$0]  %s1754_s3, 4096, %s48_s1, [#allocation6], %s1627_s12, %s1627_s12, %s1628_s13  }
  0x2f   :  { %s1634_s10 = smov [#allocation10]  }
  0x30   :  { %s75_s11 = sshll.u32 %s1634_s10, 4  ;;  %s76_s11 = int_to_ptr.vmem [resolvable:$true] %s75_s11 }
  0x31   :  { %s1586_s14 = scalar_lea.vmem %s76_s11, 3072  ;;  %p1591_p7 = scmp.lt.s32.totalorder %s76_s11, %s76_s11 }
  0x32   :  { %p1587_p6 = scmp.ne.s32.totalorder %s76_s11, %s1586_s14  ;;  %p1592_p8 = scmp.lt.s32.totalorder %s1586_s14, %s1586_s14 }
  0x34   :  { %p1593_p9 = por %p1592_p8, %p1591_p7 }
  0x36   :  { %p1594_p10 = pnand %p1593_p9, %p1587_p6 }
  0x38   :  { %1597 = shalt.err (!%p1594_p10)
}
  0x39   :  { %s1635_s0 = smov 64   ;;  %s1636_s15 = smov 4  }
  0x3a   :  { %81 = dma.hbm_to_vmem [thread:$0]  %s1758_s7, 3072, %s76_s11, [#allocation9], %s1635_s0, %s1635_s0, %s1636_s15  }
  0x3b   :  { %1618 = dma.done.wait [#allocation3], 128  }
  0x3c   :  { %1619 = vsyncadd [#allocation3], 4294967168 }
  0x3d   :  { %1620 = dma.done.wait [#allocation6], 4608  }
  0x3e   :  { %1621 = vsyncadd [#allocation6], 4294962688 }
  0x3f   :  { %1622 = dma.done.wait [#allocation9], 9216  }
  0x40   :  { %1623 = vsyncadd [#allocation9], 4294958080  ;;  %v1637_v0 = vmov 0   ;;  %v1356_v1 = vld [vmem:[#allocation5 + $0x14] ss:$8 sps:$4 sm:$0xff]   ;;  %vm138_vm0 = vcmask 261120  }
  0x41   :  { %174 = vmatprep.mubr.bf16.mxu0 %v1637_v0  ;;  %v1358_v2 = vld [vmem:[#allocation5 + $0x10] ss:$8 sps:$4 sm:$0xff]   ;;  %154 = vmatprep.subr.bf16.mxu0 %v1356_v1  ;;  %v1359_v3 = vld [vmem:[#allocation5 + $0x4] ss:$8 sps:$4 sm:$0xff]   ;;  %v1361_v4 = vld [vmem:[#allocation5] ss:$8 sps:$4 sm:$0xff]  }
  0x42   :  { %v100_v5 = vld [vmem:[#allocation2] sm:$0xff]  ;;  %155 = vmatpush1.bf16.msra.mxu0 %v1358_v2  ;;  %v1365_v8 = vld [vmem:[#allocation7 + $0x64] ss:$8 sps:$4 sm:$0xff]   ;;  %v1367_v10 = vld [vmem:[#allocation7 + $0x60] ss:$8 sps:$4 sm:$0xff]   ;;  %vm1639_vm1 = vmmov 0  }
  0x43   :  { %v1362_v6 = vld [vmem:[#allocation7 + $0x74] ss:$8 sps:$4 sm:$0xff]   ;;  %156 = vmatprep.subr.bf16.mxu0 %v1359_v3  ;;  %v1364_v7 = vld [vmem:[#allocation7 + $0x70] ss:$8 sps:$4 sm:$0xff]   ;;  %v101_v9 = vpack.c.bf16 %v100_v5, %v100_v5  ;;  %v1371_v13 = vld [vmem:[#allocation7 + $0x44] ss:$8 sps:$4 sm:$0xff]  }
  0x44   :  { %391 = vmatprep.subr.bf16.mxu1 %v1362_v6  ;;  %v1368_v11 = vld [vmem:[#allocation7 + $0x54] ss:$8 sps:$4 sm:$0xff]   ;;  %v1370_v12 = vld [vmem:[#allocation7 + $0x50] ss:$8 sps:$4 sm:$0xff]   ;;  %v1373_v14 = vld [vmem:[#allocation7 + $0x40] ss:$8 sps:$4 sm:$0xff]  }
  0x45   :  { %392 = vmatpush1.bf16.msra.mxu1 %v1364_v7  ;;  %v1374_v15 = vld [vmem:[#allocation7 + $0x34] ss:$8 sps:$4 sm:$0xff]   ;;  %v1376_v16 = vld [vmem:[#allocation7 + $0x30] ss:$8 sps:$4 sm:$0xff]   ;;  %v1377_v17 = vld [vmem:[#allocation7 + $0x24] ss:$8 sps:$4 sm:$0xff]  }
  0x46   :  { %157 = vmatpush1.bf16.msra.mxu0 %v1361_v4  ;;  %393 = vmatprep.subr.bf16.mxu1 %v1365_v8  ;;  %v1379_v18 = vld [vmem:[#allocation7 + $0x20] ss:$8 sps:$4 sm:$0xff]   ;;  %v1380_v19 = vld [vmem:[#allocation7 + $0x14] ss:$8 sps:$4 sm:$0xff]   ;;  %v1382_v20 = vld [vmem:[#allocation7 + $0x10] ss:$8 sps:$4 sm:$0xff]   ;;  %v108_v4 = vlaneseq }
  0x47   :  { %v1383_v21 = vld [vmem:[#allocation7 + $0x4] ss:$8 sps:$4 sm:$0xff]   ;;  %v1385_v22 = vld [vmem:[#allocation7] ss:$8 sps:$4 sm:$0xff]   ;;  %v1386_v23 = vld [vmem:[#allocation7 + $0xf4] ss:$8 sps:$4 sm:$0xff]  }
  0x48   :  { %v1388_v24 = vld [vmem:[#allocation7 + $0xf0] ss:$8 sps:$4 sm:$0xff]   ;;  %v1389_v25 = vld [vmem:[#allocation7 + $0xe4] ss:$8 sps:$4 sm:$0xff]   ;;  %v1391_v26 = vld [vmem:[#allocation7 + $0xe0] ss:$8 sps:$4 sm:$0xff]  }
  0x49   :  { %1162 = vmatmul.mubr.msk.bf16.vlgmr.msra.gmra.mxu0 %vm138_vm0, %v101_v9  ;;  %394 = vmatpush1.bf16.msra.mxu1 %v1367_v10  ;;  %v1392_v27 = vld [vmem:[#allocation7 + $0xd4] ss:$8 sps:$4 sm:$0xff]   ;;  %v1394_v28 = vld [vmem:[#allocation7 + $0xd0] ss:$8 sps:$4 sm:$0xff]   ;;  %v1395_v29 = vld [vmem:[#allocation7 + $0xc4] ss:$8 sps:$4 sm:$0xff]  }
  0x4a   :  { %395 = vmatprep.subr.bf16.mxu1 %v1368_v11  ;;  %v1397_v30 = vld [vmem:[#allocation7 + $0xc0] ss:$8 sps:$4 sm:$0xff]   ;;  %v1398_v31 = vld [vmem:[#allocation7 + $0xb4] ss:$8 sps:$4 sm:$0xff]   ;;  %v1400_v32 = vld [vmem:[#allocation7 + $0xb0] ss:$8 sps:$4 sm:$0xff]  }
  0x4b   :  { %v1401_v33 = vld [vmem:[#allocation7 + $0xa4] ss:$8 sps:$4 sm:$0xff]   ;;  %v1403_v34 = vld [vmem:[#allocation7 + $0xa0] ss:$8 sps:$4 sm:$0xff]   ;;  %v1404_v35 = vld [vmem:[#allocation7 + $0x94] ss:$8 sps:$4 sm:$0xff]  }
  0x4c   :  { %v1406_v36 = vld [vmem:[#allocation7 + $0x90] ss:$8 sps:$4 sm:$0xff]   ;;  %v1407_v37 = vld [vmem:[#allocation7 + $0x84] ss:$8 sps:$4 sm:$0xff]   ;;  %v1409_v38 = vld [vmem:[#allocation7 + $0x80] ss:$8 sps:$4 sm:$0xff]  }
  0x4d   :  { %396 = vmatpush1.bf16.msra.mxu1 %v1370_v12  ;;  %v1410_v39 = vld [vmem:[#allocation8 + $0xa8] ss:$12 sps:$4 sm:$0xff]   ;;  %v1412_v40 = vld [vmem:[#allocation8 + $0xac] ss:$12 sps:$4 sm:$0xff]   ;;  %v1413_v42 = vld [vmem:[#allocation8 + $0x90] ss:$12 sps:$4 sm:$0xff]  }
  0x4e   :  { %397 = vmatprep.subr.bf16.mxu1 %v1371_v13  ;;  %v1415_v41 = vld [vmem:[#allocation8 + $0x94] ss:$12 sps:$4 sm:$0xff]   ;;  %773 = vmatprep.subr.bf16.mxu0 %v1412_v40  ;;  %v1418_v43 = vld [vmem:[#allocation8 + $0x7c] ss:$12 sps:$4 sm:$0xff]   ;;  %v1416_v45 = vld [vmem:[#allocation8 + $0x78] ss:$12 sps:$4 sm:$0xff]  }
  0x4f   :  { %774 = vmatpush1.bf16.msra.mxu0 %v1410_v39  ;;  %v1437_v44 = vld [vmem:[#allocation8 + $0x170] ss:$12 sps:$4 sm:$0xff]   ;;  %v1419_v47 = vld [vmem:[#allocation8 + $0x60] ss:$12 sps:$4 sm:$0xff]   ;;  %v1422_v49 = vld [vmem:[#allocation8 + $0x48] ss:$12 sps:$4 sm:$0xff]  }
  0x50   :  { %775 = vmatprep.subr.bf16.mxu0 %v1415_v41  ;;  %v1421_v46 = vld [vmem:[#allocation8 + $0x64] ss:$12 sps:$4 sm:$0xff]   ;;  %v1424_v48 = vld [vmem:[#allocation8 + $0x4c] ss:$12 sps:$4 sm:$0xff]   ;;  %v1427_v50 = vld [vmem:[#allocation8 + $0x34] ss:$12 sps:$4 sm:$0xff]  }
  0x51   :  { %398 = vmatpush1.bf16.msra.mxu1 %v1373_v14  ;;  %v1425_v51 = vld [vmem:[#allocation8 + $0x30] ss:$12 sps:$4 sm:$0xff]   ;;  %v1428_v53 = vld [vmem:[#allocation8 + $0x18] ss:$12 sps:$4 sm:$0xff]   ;;  %v1431_v55 = vld [vmem:[#allocation8] ss:$12 sps:$4 sm:$0xff]  }
  0x52   :  { %399 = vmatprep.subr.bf16.mxu1 %v1374_v15  ;;  %v1430_v52 = vld [vmem:[#allocation8 + $0x1c] ss:$12 sps:$4 sm:$0xff]   ;;  %v1433_v54 = vld [vmem:[#allocation8 + $0x4] ss:$12 sps:$4 sm:$0xff]   ;;  %v1436_v56 = vld [vmem:[#allocation8 + $0x16c] ss:$12 sps:$4 sm:$0xff]  }
  0x53   :  { %776 = vmatpush1.bf16.msra.mxu0 %v1413_v42  ;;  %v1434_v57 = vld [vmem:[#allocation8 + $0x168] ss:$12 sps:$4 sm:$0xff]   ;;  %v1439_v59 = vld [vmem:[#allocation8 + $0x150] ss:$12 sps:$4 sm:$0xff]   ;;  %v1444_v61 = vld [vmem:[#allocation8 + $0x138] ss:$12 sps:$4 sm:$0xff]  }
  0x54   :  { %777 = vmatprep.subr.bf16.mxu0 %v1418_v43  ;;  %v1441_v58 = vld [vmem:[#allocation8 + $0x154] ss:$12 sps:$4 sm:$0xff]   ;;  %v1446_v60 = vld [vmem:[#allocation8 + $0x13c] ss:$12 sps:$4 sm:$0xff]   ;;  %v1451_v62 = vld [vmem:[#allocation8 + $0x124] ss:$12 sps:$4 sm:$0xff]  }
  0x55   :  { %400 = vmatpush1.bf16.msra.mxu1 %v1376_v16  ;;  %v1449_v63 = vld [vmem:[#allocation8 + $0x120] ss:$12 sps:$4 sm:$0xff]   ;;  %v1454_v1 = vld [vmem:[#allocation8 + $0x108] ss:$12 sps:$4 sm:$0xff]   ;;  %v1459_v3 = vld [vmem:[#allocation8 + $0xf0] ss:$12 sps:$4 sm:$0xff]  }
  0x56   :  { %401 = vmatprep.subr.bf16.mxu1 %v1377_v17  ;;  %v1456_v0 = vld [vmem:[#allocation8 + $0x10c] ss:$12 sps:$4 sm:$0xff]   ;;  %v1461_v2 = vld [vmem:[#allocation8 + $0xf4] ss:$12 sps:$4 sm:$0xff]   ;;  %v1712_v5 = vshrl.u32 %v108_v4, 7  ;;  %v1638_v41 = vmov 0.0  }
  0x57   :  { %778 = vmatpush1.bf16.msra.mxu0 %v1416_v45  ;;  %v106_v7 = vld [vmem:[%s1753_s2] sm:$0x3]  ;;  %v1473_v39 = vld [vmem:[#allocation8 + $0x8] ss:$12 sps:$4 sm:$0xff]   ;;  %s1640_s19 = smov [#allocation11]  }
  0x58   :  { %779 = vmatprep.subr.bf16.mxu0 %v1421_v46  ;;  %v1715_v6 = vsub.s32 0, %v1712_v5  ;;  %v1721_v8 = vsub.s32 1, %v1712_v5  ;;  %v1474_v40 = vld [vmem:[#allocation10 + $0x78] sm:$0xff]   ;;  %s1147_s20 = sshll.u32 %s1640_s19, 4  ;;  %s1148_s20 = int_to_ptr.vmem [resolvable:$true] %s1147_s20 }
  0x59   :  { %402 = vmatpush1.bf16.msra.mxu1 %v1379_v18  ;;  %v219_v42 = vld [vmem:[%s1755_s4] sm:$0x3]  ;;  %s1598_s21 = scalar_lea.vmem %s1148_s20, 64  ;;  %p1603_p12 = scmp.lt.s32.totalorder %s1148_s20, %s1148_s20 }
  0x5a   :  { %403 = vmatprep.subr.bf16.mxu1 %v1380_v19  ;;  %v111_v9 = vrot.slane %v106_v7, %v1715_v6  ;;  %v115_v10 = vrot.slane %v106_v7, %v1721_v8  ;;  %v224_v43 = vrot.slane %v219_v42, %v1715_v6  ;;  %v1488_v4 = vld [vmem:[#allocation10 + $0x98] sm:$0xff]   ;;  %v1489_v7 = vld [vmem:[#allocation10 + $0x50] sm:$0xff]   ;;  %p1599_p11 = scmp.ne.s32.totalorder %s1148_s20, %s1598_s21  ;;  %p1604_p13 = scmp.lt.s32.totalorder %s1598_s21, %s1598_s21 }
  0x5b   :  { %780 = vmatpush1.bf16.msra.mxu0 %v1419_v47 }
  0x5c   :  { %781 = vmatprep.subr.bf16.mxu0 %v1424_v48  ;;  %p1605_p0 = por %p1604_p13, %p1603_p12 }
  0x5d   :  { %404 = vmatpush1.bf16.msra.mxu1 %v1382_v20  ;;  %v1438_v20 = vld [vmem:[#allocation8 + $0xb0] ss:$12 sps:$4 sm:$0xff]  }
  0x5e   :  { %405 = vmatprep.subr.bf16.mxu1 %v1383_v21  ;;  %p1606_p1 = pnand %p1605_p0, %p1599_p11 }
  0x5f   :  { %782 = vmatpush1.bf16.msra.mxu0 %v1422_v49 }
  0x60   :  { %783 = vmatprep.subr.bf16.mxu0 %v1427_v50 }
  0x61   :  { %406 = vmatpush1.bf16.msra.mxu1 %v1385_v22  ;;  %v1442_v22 = vld [vmem:[#allocation8 + $0x158] ss:$12 sps:$4 sm:$0xff]  }
  0x62   :  { %407 = vmatprep.subr.bf16.mxu1 %v1386_v23  ;;  %v1443_v23 = vld [vmem:[#allocation8 + $0x98] ss:$12 sps:$4 sm:$0xff]  }
  0x63   :  { %784 = vmatpush1.bf16.msra.mxu0 %v1425_v51 }
  0x64   :  { %785 = vmatprep.subr.bf16.mxu0 %v1430_v52 }
  0x65   :  { %408 = vmatpush2.bf16.msra.mxu1 %v1388_v24  ;;  %v1447_v24 = vld [vmem:[#allocation8 + $0x140] ss:$12 sps:$4 sm:$0xff]  }
  0x66   :  { %409 = vmatprep.subr.bf16.mxu1 %v1389_v25  ;;  %v1448_v25 = vld [vmem:[#allocation8 + $0x80] ss:$12 sps:$4 sm:$0xff]  }
  0x67   :  { %786 = vmatpush1.bf16.msra.mxu0 %v1428_v53 }
  0x68   :  { %787 = vmatprep.subr.bf16.mxu0 %v1433_v54  ;;  %v1475_v54 = vld [vmem:[#allocation10 + $0x38] sm:$0xff]  }
  0x69   :  { %410 = vmatpush2.bf16.msra.mxu1 %v1391_v26  ;;  %v1452_v26 = vld [vmem:[#allocation8 + $0x128] ss:$12 sps:$4 sm:$0xff]  }
  0x6a   :  { %411 = vmatprep.subr.bf16.mxu1 %v1392_v27  ;;  %v1453_v27 = vld [vmem:[#allocation8 + $0x68] ss:$12 sps:$4 sm:$0xff]  }
  0x6b   :  { %788 = vmatpush1.bf16.msra.mxu0 %v1431_v55  ;;  %v1476_v55 = vld [vmem:[#allocation10 + $0xb8] sm:$0xff]  }
  0x6c   :  { %789 = vmatprep.subr.bf16.mxu0 %v1436_v56 }
  0x6d   :  { %412 = vmatpush2.bf16.msra.mxu1 %v1394_v28  ;;  %v1457_v28 = vld [vmem:[#allocation8 + $0x110] ss:$12 sps:$4 sm:$0xff]  }
  0x6e   :  { %413 = vmatprep.subr.bf16.mxu1 %v1395_v29  ;;  %v1458_v29 = vld [vmem:[#allocation8 + $0x50] ss:$12 sps:$4 sm:$0xff]  }
  0x6f   :  { %790 = vmatpush2.bf16.msra.mxu0 %v1434_v57  ;;  %v1477_v57 = vld [vmem:[#allocation10 + $0x70] sm:$0xff]  }
  0x70   :  { %791 = vmatprep.subr.bf16.mxu0 %v1441_v58  ;;  %v1478_v58 = vld [vmem:[#allocation10 + $0x30] sm:$0xff]  }
  0x71   :  { %414 = vmatpush2.bf16.msra.mxu1 %v1397_v30  ;;  %v1462_v30 = vld [vmem:[#allocation8 + $0xf8] ss:$12 sps:$4 sm:$0xff]  }
  0x72   :  { %415 = vmatprep.subr.bf16.mxu1 %v1398_v31  ;;  %v1463_v31 = vld [vmem:[#allocation8 + $0x38] ss:$12 sps:$4 sm:$0xff]  }
  0x73   :  { %792 = vmatpush2.bf16.msra.mxu0 %v1439_v59  ;;  %v1479_v59 = vld [vmem:[#allocation10 + $0xb0] sm:$0xff]  }
  0x74   :  { %793 = vmatprep.subr.bf16.mxu0 %v1446_v60  ;;  %v1480_v60 = vld [vmem:[#allocation10 + $0x68] sm:$0xff]  }
  0x75   :  { %416 = vmatpush2.bf16.msra.mxu1 %v1400_v32  ;;  %v1466_v32 = vld [vmem:[#allocation8 + $0xdc] ss:$12 sps:$4 sm:$0xff]  }
  0x76   :  { %417 = vmatprep.subr.bf16.mxu1 %v1401_v33  ;;  %v1467_v33 = vld [vmem:[#allocation8 + $0xe0] ss:$12 sps:$4 sm:$0xff]  }
  0x77   :  { %794 = vmatpush2.bf16.msra.mxu0 %v1444_v61  ;;  %v1481_v61 = vld [vmem:[#allocation10 + $0x28] sm:$0xff]  }
  0x78   :  { %795 = vmatprep.subr.bf16.mxu0 %v1451_v62  ;;  %v1482_v62 = vld [vmem:[#allocation10 + $0xa8] sm:$0xff]  }
  0x79   :  { %418 = vmatpush2.bf16.msra.mxu1 %v1403_v34  ;;  %v1464_v34 = vld [vmem:[#allocation8 + $0xd8] ss:$12 sps:$4 sm:$0xff]  }
  0x7a   :  { %419 = vmatprep.subr.bf16.mxu1 %v1404_v35  ;;  %v1468_v35 = vld [vmem:[#allocation8 + $0x20] ss:$12 sps:$4 sm:$0xff]  }
  0x7b   :  { %796 = vmatpush2.bf16.msra.mxu0 %v1449_v63  ;;  %v1483_v63 = vld [vmem:[#allocation10 + $0x60] sm:$0xff]  }
  0x7c   :  { %797 = vmatprep.subr.bf16.mxu0 %v1456_v0  ;;  %v1484_v0 = vld [vmem:[#allocation10 + $0x20] sm:$0xff]  }
  0x7d   :  { %420 = vmatpush2.bf16.msra.mxu1 %v1406_v36  ;;  %v1471_v36 = vld [vmem:[#allocation8 + $0xc4] ss:$12 sps:$4 sm:$0xff]  }
  0x7e   :  { %421 = vmatprep.subr.bf16.mxu1 %v1407_v37  ;;  %v1472_v37 = vld [vmem:[#allocation8 + $0xc8] ss:$12 sps:$4 sm:$0xff]  }
  0x7f   :  { %798 = vmatpush2.bf16.msra.mxu0 %v1454_v1  ;;  %v1485_v1 = vld [vmem:[#allocation10 + $0xa0] sm:$0xff]  }
  0x80   :  { %799 = vmatprep.subr.bf16.mxu0 %v1461_v2  ;;  %v1486_v2 = vld [vmem:[#allocation10 + $0x58] sm:$0xff]  }
  0x81   :  { %422 = vmatpush2.bf16.msra.mxu1 %v1409_v38  ;;  %v1469_v38 = vld [vmem:[#allocation8 + $0xc0] ss:$12 sps:$4 sm:$0xff]  }
  0x82   :  { %1268 = vmatprep.subr.bf16.mxu1 %v1437_v44  ;;  %v228_v44 = vrot.slane %v219_v42, %v1721_v8 }
  0x83   :  { %800 = vmatpush2.bf16.msra.mxu0 %v1459_v3  ;;  %v1487_v3 = vld [vmem:[#allocation10 + $0x18] sm:$0xff]  }
  0x84   :  { %801 = vmatprep.subr.bf16.mxu0 %v1466_v32 }
  0x87   :  { %802 = vmatpush2.bf16.msra.mxu0 %v1464_v34 }
  0x88   :  { %803 = vmatprep.subr.bf16.mxu0 %v1471_v36 }
  0x8b   :  { %804 = vmatpush2.bf16.msra.mxu0 %v1469_v38 }
  0x8c   :  { %1290 = vmatprep.subr.bf16.mxu0 %v1474_v40 }
 0x109   :  { %v176_v11 = vpop.f32.mrf.mxu0 }
 0x10a   :  { %v177_v12 = vadd.f32 %v176_v11, %v111_v9  ;;  %v1490_v9 = vld [vmem:[#allocation10 + $0x10] sm:$0xff]   ;;  %v1492_v11 = vld [vmem:[#allocation10 + $0x48] sm:$0xff]  }
 0x10b   :  { %v178_v13 = vpop.f32.mrf.mxu0 }
 0x10c   :  { %v179_v14 = vadd.f32 %v178_v13, %v115_v10  ;;  %v183_v15 = vmax.f32 %v177_v12, 0.0  ;;  %v1491_v10 = vld [vmem:[#allocation10 + $0x90] sm:$0xff]   ;;  %v1493_v12 = vld [vmem:[#allocation10 + $0x8] sm:$0xff]  }
 0x10d   :  { %v180_v16 = vpop.f32.mrf.mxu0  ;;  %v1494_v13 = vld [vmem:[#allocation10 + $0x88] sm:$0xff]  }
 0x10e   :  { %v184_v17 = vmax.f32 %v179_v14, 0.0  ;;  %v185_v21 = vpack.c.bf16 %v183_v15, %v183_v15  ;;  %v1495_v14 = vld [vmem:[#allocation10 + $0x40] sm:$0xff]  }
 0x10f   :  { %v181_v18 = vpop.f32.mrf.mxu0  ;;  %v1496_v15 = vld [vmem:[#allocation10] sm:$0xff]  }
 0x110   :  { %v186_v19 = vpack.c.bf16 %v184_v17, %v184_v17  ;;  %v1497_v16 = vld [vmem:[#allocation10 + $0x80] sm:$0xff]   ;;  %v500_v17 = vld [vmem:[%s1757_s6] sm:$0x7] }
 0x111   :  { %v505_v18 = vrot.slane %v500_v17, %v1715_v6 }
 0x112   :  { %423 = vmatprep.mubr.bf16.mxu1 %v186_v19  ;;  %v512_v19 = vsub.s32 2, %v1712_v5 }
 0x113   :  { %424 = vmatmul.mubr.bf16.vlgmr.msra.gmra.mxu1 %v185_v21 }
 0x114   :  { %1269 = vmatpush3.bf16.msra.mxu1 %v1438_v20  ;;  %v509_v20 = vrot.slane %v500_v17, %v1721_v8 }
 0x115   :  { %1270 = vmatprep.subr.bf16.mxu1 %v1442_v22 }
 0x118   :  { %1271 = vmatpush3.bf16.msra.mxu1 %v1443_v23 }
 0x119   :  { %1272 = vmatprep.subr.bf16.mxu1 %v1447_v24  ;;  %v513_v24 = vrot.slane %v500_v17, %v512_v19 }
 0x11c   :  { %1273 = vmatpush3.bf16.msra.mxu1 %v1448_v25 }
 0x11d   :  { %1274 = vmatprep.subr.bf16.mxu1 %v1452_v26 }
 0x120   :  { %1275 = vmatpush3.bf16.msra.mxu1 %v1453_v27 }
 0x121   :  { %1276 = vmatprep.subr.bf16.mxu1 %v1457_v28 }
 0x124   :  { %1277 = vmatpush3.bf16.msra.mxu1 %v1458_v29 }
 0x125   :  { %1278 = vmatprep.subr.bf16.mxu1 %v1462_v30 }
 0x128   :  { %1279 = vmatpush3.bf16.msra.mxu1 %v1463_v31 }
 0x129   :  { %1280 = vmatprep.subr.bf16.mxu1 %v1467_v33 }
 0x12c   :  { %1281 = vmatpush3.bf16.msra.mxu1 %v1468_v35 }
 0x12d   :  { %1282 = vmatprep.subr.bf16.mxu1 %v1472_v37 }
 0x130   :  { %1283 = vmatpush3.bf16.msra.mxu1 %v1473_v39  ;;  %v1243_v39 = vld [vmem:[%s1759_s8] ss:$0 sm:$0xff] }
 0x131   :  { %1321 = vmatprep.subr.bf16.mxu1 %v1638_v41 }
 0x1d3   :  { %v425_v45 = vpop.f32.mrf.mxu1 }
 0x1d4   :  { %v426_v46 = vadd.f32 %v425_v45, %v224_v43 }
 0x1d5   :  { %v427_v47 = vpop.f32.mrf.mxu1 }
 0x1d6   :  { %v428_v48 = vadd.f32 %v427_v47, %v228_v44  ;;  %v432_v49 = vmax.f32 %v426_v46, 0.0 }
 0x1d7   :  { %v429_v50 = vpop.f32.mrf.mxu1 }
 0x1d8   :  { %v433_v51 = vmax.f32 %v428_v48, 0.0  ;;  %v434_v56 = vpack.c.bf16 %v432_v49, %v432_v49 }
 0x1d9   :  { %v430_v52 = vpop.f32.mrf.mxu1 }
 0x1da   :  { %v435_v53 = vpack.c.bf16 %v433_v51, %v433_v51 }
 0x1dc   :  { %805 = vmatprep.mubr.bf16.mxu0 %v435_v53  ;;  %846 = vmatprep.mubr.bf16.mxu1 %v435_v53 }
 0x1dd   :  { %806 = vmatmul.mubr.bf16.vlgmr.msra.gmra.mxu0 %v434_v56  ;;  %847 = vmatmul.mubr.bf16.vlgmr.msra.gmra.mxu1 %v434_v56 }
 0x1de   :  { %1291 = vmatpush3.bf16.msra.mxu0 %v1475_v54  ;;  %1322 = vmatpush3.bf16.msra.mxu1 %v1476_v55 }
 0x1df   :  { %1292 = vmatprep.subr.bf16.mxu0 %v1477_v57  ;;  %1323 = vmatprep.subr.bf16.mxu1 %v1638_v41 }
 0x1e0   :  { %1337 = vmatprep.mubr.msk.bf16.mxu1 %vm1639_vm1, %v1638_v41 }
 0x1e2   :  { %1293 = vmatpush3.bf16.msra.mxu0 %v1478_v58  ;;  %1324 = vmatpush3.bf16.msra.mxu1 %v1479_v59 }
 0x1e3   :  { %1294 = vmatprep.subr.bf16.mxu0 %v1480_v60  ;;  %1325 = vmatprep.subr.bf16.mxu1 %v1638_v41 }
 0x1e6   :  { %1295 = vmatpush3.bf16.msra.mxu0 %v1481_v61  ;;  %1326 = vmatpush3.bf16.msra.mxu1 %v1482_v62 }
 0x1e7   :  { %1296 = vmatprep.subr.bf16.mxu0 %v1483_v63  ;;  %1327 = vmatprep.subr.bf16.mxu1 %v1638_v41 }
 0x1ea   :  { %1297 = vmatpush3.bf16.msra.mxu0 %v1484_v0  ;;  %1328 = vmatpush3.bf16.msra.mxu1 %v1485_v1 }
 0x1eb   :  { %1298 = vmatprep.subr.bf16.mxu0 %v1486_v2  ;;  %1329 = vmatprep.subr.bf16.mxu1 %v1638_v41 }
 0x1ee   :  { %1299 = vmatpush3.bf16.msra.mxu0 %v1487_v3  ;;  %1330 = vmatpush3.bf16.msra.mxu1 %v1488_v4 }
 0x1ef   :  { %1300 = vmatprep.subr.bf16.mxu0 %v1489_v7  ;;  %1331 = vmatprep.subr.bf16.mxu1 %v1638_v41 }
 0x1f2   :  { %1301 = vmatpush3.bf16.msra.mxu0 %v1490_v9  ;;  %1332 = vmatpush3.bf16.msra.mxu1 %v1491_v10 }
 0x1f3   :  { %1333 = vmatprep.subr.bf16.mxu1 %v1638_v41  ;;  %1302 = vmatprep.subr.bf16.mxu0 %v1492_v11 }
 0x1f6   :  { %1303 = vmatpush3.bf16.msra.mxu0 %v1493_v12  ;;  %1334 = vmatpush3.bf16.msra.mxu1 %v1494_v13 }
 0x1f7   :  { %1335 = vmatprep.subr.bf16.mxu1 %v1638_v41  ;;  %1304 = vmatprep.subr.bf16.mxu0 %v1495_v14 }
 0x1fa   :  { %1305 = vmatpush3.bf16.msra.mxu0 %v1496_v15  ;;  %1336 = vmatpush3.bf16.msra.mxu1 %v1497_v16 }
 0x29d   :  { %v807_v21 = vpop.f32.mrf.mxu0  ;;  %v1284_v22 = vpop.f32.mrf.mxu1 }
 0x29e   :  { %v808_v23 = vadd.f32 %v807_v21, %v505_v18 }
 0x29f   :  { %v809_v25 = vpop.f32.mrf.mxu0  ;;  %v1285_v26 = vpop.f32.mrf.mxu1 }
 0x2a0   :  { %v810_v27 = vadd.f32 %v809_v25, %v509_v20  ;;  %v1286_v28 = vadd.f32 %v1285_v26, %v1284_v22  ;;  %v854_v29 = vmax.f32 %v808_v23, 0.0 }
 0x2a1   :  { %v811_v30 = vpop.f32.mrf.mxu0  ;;  %v1287_v31 = vpop.f32.mrf.mxu1 }
 0x2a2   :  { %v855_v32 = vmax.f32 %v810_v27, 0.0  ;;  %v849_v33 = vadd.f32 %v1286_v28, %v513_v24  ;;  %v857_v5 = vpack.c.bf16 %v854_v29, %v854_v29 }
 0x2a3   :  { %v812_v34 = vpop.f32.mrf.mxu0  ;;  %v1288_v35 = vpop.f32.mrf.mxu1 }
 0x2a4   :  { %v858_v6 = vpack.c.bf16 %v855_v32, %v855_v32  ;;  %v856_v36 = vmax.f32 %v849_v33, 0.0 }
 0x2a6   :  { %v859_v37 = vpack.c.bf16 %v856_v36, %v856_v36  ;;  %1091 = vmatprep.mubr.bf16.mxu0 %v858_v6 }
 0x2a7   :  { %1092 = vmatmul.mubr.bf16.vlgmr.msra.gmra.mxu0 %v857_v5 }
 0x2a8   :  { %1338 = vmatmul.mubr.bf16.vlgmr.msra.gmra.mxu1 %v859_v37 }
 0x367   :  { %v1306_v8 = vpop.f32.mrf.mxu0 }
 0x368   :  { %v1133_v38 = vpop.f32.mrf.mxu1 }
 0x369   :  { %v1307_v40 = vpop.f32.mrf.mxu0 }
 0x36a   :  { %v1308_v41 = vadd.f32 %v1307_v40, %v1306_v8  ;;  %v1339_v42 = vpop.f32.mrf.mxu1 }
 0x36b   :  { %v1309_v43 = vpop.f32.mrf.mxu0 }
 0x36c   :  { %v1094_v44 = vadd.f32 %v1308_v41, %v1243_v39  ;;  %v1136_v45 = vpop.f32.mrf.mxu1 }
 0x36d   :  { %v1310_v46 = vpop.f32.mrf.mxu0 }
 0x36e   :  { %v1340_v47 = vpop.f32.mrf.mxu1  ;;  %v1134_v48 = vadd.f32 %v1133_v38, %v1094_v44 }
 0x370   :  { %v1139_v49 = vpack.c.bf16 %v1134_v48, %v1134_v48 }
 0x372   :  { %1140 = vst [vmem:[#allocation11] sm:$0xf] %v1139_v49 }
 0x373   :  { %1609 = shalt.err (!%p1606_p1)
}
 0x374   :  { %1150 = dma.vmem_to_hbm [thread:$0]  %s1148_s20, 64, %s1760_s9, [#allocation4]  }
 0x375   :  { %1624 = dma.done.wait [#allocation4], 64  }
 0x376   :  { %1625 = vsyncadd [#allocation4], 4294967232 }
 0x377   :  { %1154 = vsyncpa [#allocation3], 1 }
 0x378   :  { %1155 = vsyncpa [#allocation6], 1 }
 0x379   :  { %1156 = vsyncpa [#allocation9], 1 }
 0x37a   :  { %1157 = vsyncpa [#allocation4], 1 }

</bundles_post_ra>
